<compile_context>
chip_gen: v5e
topology: v5e:2x2
jax: 0.10.0
libtpu: 0.0.40
codegen_flags: <defaults>
</compile_context>

<pallas_src>
import jax
import jax.numpy as jnp
from jax.experimental import pallas as pl
from jax.experimental.pallas import tpu as pltpu

# ---------------- model hyper-parameters (small but forward-consistent) -------
NUM_LAYER = 3
MEL_BINS  = 32          # "mel_bins" (out channels of extractor / encoder width)
WIN_LEN   = 16          # extractor kernel size
HOP_LEN   = 4           # extractor stride
PAD       = WIN_LEN // 2
T_OUT     = 81          # LayerNorm(81) in the module hard-codes the time dim
T_PAD     = 128         # lane-padded time axis
SEQ_LEN   = (T_OUT - 1) * HOP_LEN   # => floor(SEQ_LEN/HOP)+1 == 81
BATCH     = 2
LN_EPS    = 1e-5
LEAK      = 0.2


# ------------------------------- Pallas kernel --------------------------------
def tgram_kernel(pat_ref, wext_ref, gamma_ref, beta_ref, wenc_ref, out_ref):
    # pat_ref  : (K, B*TP)  bf16 im2col patches, per-batch time lane-padded w/ 0
    # wext_ref : (C, K)     bf16 extractor conv weight
    # gamma_ref: (L, 1, TP) f32 LayerNorm weights (padded to 128 lanes)
    # beta_ref : (L, 1, TP) f32 LayerNorm biases
    # wenc_ref : (L, C, 3C) bf16 fused 3-tap conv weights, [o, k*C + i]
    # out_ref  : (B, C, TP) f32
    B, C, TP = out_ref.shape
    L = gamma_ref.shape[0]
    N = B * TP

    # valid-time mask (lane index < 81), shared by every layer / batch segment
    lane = jax.lax.broadcasted_iota(jnp.int32, (1, TP), 1)
    valid = lane < T_OUT                                        # (1, TP)

    # ---- conv_extractor: single (C,K) @ (K, B*TP) matmul on the MXU ----
    h = jnp.dot(wext_ref[...], pat_ref[...],
                preferred_element_type=jnp.float32)             # (C, N) f32

    inv_t = 1.0 / T_OUT
    for l in range(L):                                          # L=3, static
        gamma = gamma_ref[l]                                    # (1, TP)
        beta = beta_ref[l]
        segs = []
        for b in range(B):                                      # B=2, static
            seg = h[:, b * TP:(b + 1) * TP]                     # (C, TP), aligned
            segm = jnp.where(valid, seg, 0.0)                   # zero padded lanes
            # one-pass masked LayerNorm stats (divide by 81, not 128)
            s1 = jnp.sum(segm, axis=-1, keepdims=True)
            s2 = jnp.sum(segm * segm, axis=-1, keepdims=True)
            mean = s1 * inv_t
            var = s2 * inv_t - mean * mean
            inv = jax.lax.rsqrt(var + LN_EPS)                   # EUP
            a = (segm - mean) * inv * gamma + beta
            a = jnp.where(a >= 0, a, LEAK * a)                  # LeakyReLU(0.2)
            segs.append(jnp.where(valid, a, 0.0))               # re-zero padding
        act = jnp.concatenate(segs, axis=-1)                    # (C, N), zeroed pads

        # ---- Conv1d(C,C,3,pad=1,no bias) fused into one (C,3C)@(3C,N) matmul ----
        # Shifted copies via XLU lane rotation; wrap-around hits zero padding,
        # so "same" padding semantics are exact at both segment edges.
        prev = pltpu.roll(act, shift=1, axis=1)                 # act[:, t-1]
        nxt = pltpu.roll(act, shift=N - 1, axis=1)              # act[:, t+1]
        stacked = jnp.concatenate([prev, act, nxt], axis=0).astype(jnp.bfloat16)
        h = jnp.dot(wenc_ref[l], stacked,
                    preferred_element_type=jnp.float32)         # (C, N) f32

    # lane-dense (128-wide, aligned) stores, one block per batch segment
    for b in range(B):
        out_ref[b] = h[:, b * TP:(b + 1) * TP].astype(out_ref.dtype)


# ------------------------------- wrapper ---------------------------------------
def _im2col_flat(x):
    """x: (B, 1, L) -> bf16 patches (K, B*T_PAD), batch folded into lanes."""
    xp = jnp.pad(x[:, 0, :], ((0, 0), (PAD, PAD)))
    idx = jnp.arange(WIN_LEN)[:, None] + HOP_LEN * jnp.arange(T_OUT)[None, :]  # (K,T)
    patches = xp[:, idx]                                        # (B, K, T_OUT)
    patches = jnp.pad(patches, ((0, 0), (0, 0), (0, T_PAD - T_OUT)))
    return jnp.transpose(patches, (1, 0, 2)).reshape(WIN_LEN, -1).astype(jnp.bfloat16)


@jax.jit
def tgram_forward(x, wext, gammas, betas, wenc):
    """x: (B,1,L); wext: (C,K); gammas/betas: (L,81); wenc: (L,C_out,C_in,3)."""
    B = x.shape[0]
    C = wext.shape[0]
    patches = _im2col_flat(x)                                          # (K, B*128) bf16

    # lane-dense / MXU-friendly parameter packing (bf16 MXU operands)
    wext_b = wext.astype(jnp.bfloat16)                                 # (C, K)
    wenc_pk = jnp.transpose(wenc, (0, 1, 3, 2)).reshape(NUM_LAYER, C, 3 * C)
    wenc_b = wenc_pk.astype(jnp.bfloat16)                              # (L, C, 3C)
    gam = jnp.pad(gammas, ((0, 0), (0, T_PAD - T_OUT)))[:, None, :]    # (L,1,128)
    bet = jnp.pad(betas, ((0, 0), (0, T_PAD - T_OUT)))[:, None, :]     # (L,1,128)

    out_p = pl.pallas_call(
        tgram_kernel,
        out_shape=jax.ShapeDtypeStruct((B, C, T_PAD), jnp.float32),
        in_specs=[pl.BlockSpec(memory_space=pltpu.MemorySpace.VMEM)] * 5,
        out_specs=pl.BlockSpec(memory_space=pltpu.MemorySpace.VMEM),
    )(patches, wext_b, gam, bet, wenc_b)
    # drop the 47 padded time lanes (kept lane-dense inside the kernel)
    return out_p[:, :, :T_OUT]


# ----------------------- pure-JAX reference (for checking) ---------------------
def tgram_reference(x, wext, gammas, betas, wenc):
    xp = jnp.pad(x[:, 0, :], ((0, 0), (PAD, PAD)))
    idx = jnp.arange(WIN_LEN)[:, None] + HOP_LEN * jnp.arange(T_OUT)[None, :]
    patches = xp[:, idx]                                               # (B,K,T)
    h = jnp.einsum('ck,bkt->bct', wext, patches,
                   precision=jax.lax.Precision.HIGHEST)
    for l in range(NUM_LAYER):
        mean = h.mean(-1, keepdims=True)
        var = ((h - mean) ** 2).mean(-1, keepdims=True)
        hn = (h - mean) / jnp.sqrt(var + LN_EPS)
        hn = hn * gammas[l] + betas[l]
        hn = jnp.where(hn >= 0, hn, LEAK * hn)
        hp = jnp.pad(hn, ((0, 0), (0, 0), (1, 1)))
        h = sum(jnp.einsum('oi,bit->bot', wenc[l, :, :, k],
                           hp[:, :, k:k + T_OUT],
                           precision=jax.lax.Precision.HIGHEST)
                for k in range(3))
    return h


# ------------------------------- main ------------------------------------------
if __name__ == "__main__":
    key = jax.random.PRNGKey(0)
    k_x, k_wext, k_wenc = jax.random.split(key, 3)

    # input audio-like signal: (batch, 1, seq_len), NCL like PyTorch Conv1d
    x = jax.random.normal(k_x, (BATCH, 1, SEQ_LEN), dtype=jnp.float32)

    # conv_extractor weight: torch (mel_bins, 1, win_len) -> squeezed -> (C, K)
    wext = 0.05 * jax.random.normal(k_wext, (MEL_BINS, WIN_LEN), dtype=jnp.float32)

    # LayerNorm(81) params (PyTorch default init: ones / zeros)
    gammas = jnp.ones((NUM_LAYER, T_OUT), dtype=jnp.float32)
    betas = jnp.zeros((NUM_LAYER, T_OUT), dtype=jnp.float32)

    # encoder conv weights in torch layout: (num_layer, C_out, C_in, 3)
    wenc = 0.05 * jax.random.normal(
        k_wenc, (NUM_LAYER, MEL_BINS, MEL_BINS, 3), dtype=jnp.float32)

    out = jax.block_until_ready(tgram_forward(x, wext, gammas, betas, wenc))
    ref = tgram_reference(x, wext, gammas, betas, wenc)

    assert out.shape == (BATCH, MEL_BINS, T_OUT)
    # bf16 MXU operands in the kernel -> compare with a slightly loose tolerance
    assert jnp.allclose(out, ref, rtol=3e-2, atol=3e-2), "mismatch vs reference"

    print("KERNEL_OK")
</pallas_src>

<mosaic_0001>
module attributes {stable_mosaic.version = 11 : i64} {
  func.func @tgram_kernel(%arg0: memref<16x256xbf16, #tpu.memory_space<vmem>>, %arg1: memref<32x16xbf16, #tpu.memory_space<vmem>>, %arg2: memref<3x1x128xf32, #tpu.memory_space<vmem>>, %arg3: memref<3x1x128xf32, #tpu.memory_space<vmem>>, %arg4: memref<3x32x96xbf16, #tpu.memory_space<vmem>>, %arg5: memref<2x32x128xf32, #tpu.memory_space<vmem>>) attributes {dimension_semantics = [], scalar_prefetch = 0 : i64, scratch_operands = 0 : i64, tpu.core_type = #tpu.core_type<tc>} {
    %0 = tpu.iota {dimensions = array<i32: 1>} : vector<1x128xi32>
    %c81_i32 = arith.constant 81 : i32
    %1 = vector.broadcast %c81_i32 : i32 to vector<1x128xi32>
    %2 = arith.cmpi slt, %0, %1 : vector<1x128xi32>
    %c0 = arith.constant 0 : index
    %c0_0 = arith.constant 0 : index
    %3 = vector.load %arg1[%c0, %c0_0] : memref<32x16xbf16, #tpu.memory_space<vmem>>, vector<32x16xbf16>
    %c0_1 = arith.constant 0 : index
    %c0_2 = arith.constant 0 : index
    %4 = vector.load %arg0[%c0_1, %c0_2] : memref<16x256xbf16, #tpu.memory_space<vmem>>, vector<16x256xbf16>
    %cst = arith.constant dense<0.000000e+00> : vector<32x256xf32>
    %5 = tpu.matmul %3, %4, %cst {dimension_numbers = #tpu.dot_dimension_numbers<[1], [0], [0], [1], [0, 0, 1, 1], [], []>} : vector<32x16xbf16>, vector<16x256xbf16>, vector<32x256xf32> -> vector<32x256xf32>
    %c0_3 = arith.constant 0 : index
    %c0_4 = arith.constant 0 : index
    %c0_5 = arith.constant 0 : index
    %6 = vector.load %arg2[%c0_3, %c0_4, %c0_5] : memref<3x1x128xf32, #tpu.memory_space<vmem>>, vector<1x1x128xf32>
    %7 = vector.shape_cast %6 : vector<1x1x128xf32> to vector<1x128xf32>
    %c0_6 = arith.constant 0 : index
    %c0_7 = arith.constant 0 : index
    %c0_8 = arith.constant 0 : index
    %8 = vector.load %arg3[%c0_6, %c0_7, %c0_8] : memref<3x1x128xf32, #tpu.memory_space<vmem>>, vector<1x1x128xf32>
    %9 = vector.shape_cast %8 : vector<1x1x128xf32> to vector<1x128xf32>
    %10 = vector.extract_strided_slice %5 {offsets = [0, 0], sizes = [32, 128], strides = [1, 1]} : vector<32x256xf32> to vector<32x128xf32>
    %cst_9 = arith.constant 0.000000e+00 : f32
    %11 = vector.shape_cast %2 : vector<1x128xi1> to vector<1x128xi1>
    %12 = vector.broadcast %11 : vector<1x128xi1> to vector<32x128xi1>
    %13 = vector.broadcast %cst_9 : f32 to vector<32x128xf32>
    %14 = arith.select %12, %10, %13 : vector<32x128xi1>, vector<32x128xf32>
    %cst_10 = arith.constant dense<0.000000e+00> : vector<32xf32>
    %15 = vector.multi_reduction <add>, %14, %cst_10 [1] : vector<32x128xf32> to vector<32xf32>
    %16 = vector.shape_cast %15 : vector<32xf32> to vector<32x1xf32>
    %17 = arith.mulf %14, %14 : vector<32x128xf32>
    %cst_11 = arith.constant dense<0.000000e+00> : vector<32xf32>
    %18 = vector.multi_reduction <add>, %17, %cst_11 [1] : vector<32x128xf32> to vector<32xf32>
    %19 = vector.shape_cast %18 : vector<32xf32> to vector<32x1xf32>
    %cst_12 = arith.constant 0.0123456791 : f32
    %20 = vector.broadcast %cst_12 : f32 to vector<32x1xf32>
    %21 = arith.mulf %16, %20 : vector<32x1xf32>
    %cst_13 = arith.constant 0.0123456791 : f32
    %22 = vector.broadcast %cst_13 : f32 to vector<32x1xf32>
    %23 = arith.mulf %19, %22 : vector<32x1xf32>
    %24 = arith.mulf %21, %21 : vector<32x1xf32>
    %25 = arith.subf %23, %24 : vector<32x1xf32>
    %cst_14 = arith.constant 9.99999974E-6 : f32
    %26 = vector.broadcast %cst_14 : f32 to vector<32x1xf32>
    %27 = arith.addf %25, %26 : vector<32x1xf32>
    %28 = math.rsqrt %27 : vector<32x1xf32>
    %29 = vector.broadcast %21 : vector<32x1xf32> to vector<32x128xf32>
    %30 = arith.subf %14, %29 : vector<32x128xf32>
    %31 = vector.broadcast %28 : vector<32x1xf32> to vector<32x128xf32>
    %32 = arith.mulf %30, %31 : vector<32x128xf32>
    %33 = vector.broadcast %7 : vector<1x128xf32> to vector<32x128xf32>
    %34 = arith.mulf %32, %33 : vector<32x128xf32>
    %35 = vector.broadcast %9 : vector<1x128xf32> to vector<32x128xf32>
    %36 = arith.addf %34, %35 : vector<32x128xf32>
    %cst_15 = arith.constant 0.000000e+00 : f32
    %37 = vector.broadcast %cst_15 : f32 to vector<32x128xf32>
    %38 = arith.cmpf oge, %36, %37 : vector<32x128xf32>
    %cst_16 = arith.constant 2.000000e-01 : f32
    %39 = vector.broadcast %cst_16 : f32 to vector<32x128xf32>
    %40 = arith.mulf %39, %36 : vector<32x128xf32>
    %41 = arith.select %38, %36, %40 : vector<32x128xi1>, vector<32x128xf32>
    %cst_17 = arith.constant 0.000000e+00 : f32
    %42 = vector.shape_cast %2 : vector<1x128xi1> to vector<1x128xi1>
    %43 = vector.broadcast %42 : vector<1x128xi1> to vector<32x128xi1>
    %44 = vector.broadcast %cst_17 : f32 to vector<32x128xf32>
    %45 = arith.select %43, %41, %44 : vector<32x128xi1>, vector<32x128xf32>
    %46 = vector.extract_strided_slice %5 {offsets = [0, 128], sizes = [32, 128], strides = [1, 1]} : vector<32x256xf32> to vector<32x128xf32>
    %cst_18 = arith.constant 0.000000e+00 : f32
    %47 = vector.shape_cast %2 : vector<1x128xi1> to vector<1x128xi1>
    %48 = vector.broadcast %47 : vector<1x128xi1> to vector<32x128xi1>
    %49 = vector.broadcast %cst_18 : f32 to vector<32x128xf32>
    %50 = arith.select %48, %46, %49 : vector<32x128xi1>, vector<32x128xf32>
    %cst_19 = arith.constant dense<0.000000e+00> : vector<32xf32>
    %51 = vector.multi_reduction <add>, %50, %cst_19 [1] : vector<32x128xf32> to vector<32xf32>
    %52 = vector.shape_cast %51 : vector<32xf32> to vector<32x1xf32>
    %53 = arith.mulf %50, %50 : vector<32x128xf32>
    %cst_20 = arith.constant dense<0.000000e+00> : vector<32xf32>
    %54 = vector.multi_reduction <add>, %53, %cst_20 [1] : vector<32x128xf32> to vector<32xf32>
    %55 = vector.shape_cast %54 : vector<32xf32> to vector<32x1xf32>
    %cst_21 = arith.constant 0.0123456791 : f32
    %56 = vector.broadcast %cst_21 : f32 to vector<32x1xf32>
    %57 = arith.mulf %52, %56 : vector<32x1xf32>
    %cst_22 = arith.constant 0.0123456791 : f32
    %58 = vector.broadcast %cst_22 : f32 to vector<32x1xf32>
    %59 = arith.mulf %55, %58 : vector<32x1xf32>
    %60 = arith.mulf %57, %57 : vector<32x1xf32>
    %61 = arith.subf %59, %60 : vector<32x1xf32>
    %cst_23 = arith.constant 9.99999974E-6 : f32
    %62 = vector.broadcast %cst_23 : f32 to vector<32x1xf32>
    %63 = arith.addf %61, %62 : vector<32x1xf32>
    %64 = math.rsqrt %63 : vector<32x1xf32>
    %65 = vector.broadcast %57 : vector<32x1xf32> to vector<32x128xf32>
    %66 = arith.subf %50, %65 : vector<32x128xf32>
    %67 = vector.broadcast %64 : vector<32x1xf32> to vector<32x128xf32>
    %68 = arith.mulf %66, %67 : vector<32x128xf32>
    %69 = vector.broadcast %7 : vector<1x128xf32> to vector<32x128xf32>
    %70 = arith.mulf %68, %69 : vector<32x128xf32>
    %71 = vector.broadcast %9 : vector<1x128xf32> to vector<32x128xf32>
    %72 = arith.addf %70, %71 : vector<32x128xf32>
    %cst_24 = arith.constant 0.000000e+00 : f32
    %73 = vector.broadcast %cst_24 : f32 to vector<32x128xf32>
    %74 = arith.cmpf oge, %72, %73 : vector<32x128xf32>
    %cst_25 = arith.constant 2.000000e-01 : f32
    %75 = vector.broadcast %cst_25 : f32 to vector<32x128xf32>
    %76 = arith.mulf %75, %72 : vector<32x128xf32>
    %77 = arith.select %74, %72, %76 : vector<32x128xi1>, vector<32x128xf32>
    %cst_26 = arith.constant 0.000000e+00 : f32
    %78 = vector.shape_cast %2 : vector<1x128xi1> to vector<1x128xi1>
    %79 = vector.broadcast %78 : vector<1x128xi1> to vector<32x128xi1>
    %80 = vector.broadcast %cst_26 : f32 to vector<32x128xf32>
    %81 = arith.select %79, %77, %80 : vector<32x128xi1>, vector<32x128xf32>
    %82 = tpu.concatenate %45, %81 in 1 : vector<32x128xf32>, vector<32x128xf32> -> vector<32x256xf32>
    %c1_i32 = arith.constant 1 : i32
    %83 = tpu.dynamic_rotate %82 by %c1_i32 dim 1 : vector<32x256xf32>, i32 -> vector<32x256xf32>
    %c255_i32 = arith.constant 255 : i32
    %84 = tpu.dynamic_rotate %82 by %c255_i32 dim 1 : vector<32x256xf32>, i32 -> vector<32x256xf32>
    %85 = tpu.concatenate %83, %82, %84 in 0 : vector<32x256xf32>, vector<32x256xf32>, vector<32x256xf32> -> vector<96x256xf32>
    %86 = arith.truncf %85 : vector<96x256xf32> to vector<96x256xbf16>
    %c0_27 = arith.constant 0 : index
    %c0_28 = arith.constant 0 : index
    %c0_29 = arith.constant 0 : index
    %87 = vector.load %arg4[%c0_27, %c0_28, %c0_29] : memref<3x32x96xbf16, #tpu.memory_space<vmem>>, vector<1x32x96xbf16>
    %88 = vector.shape_cast %87 : vector<1x32x96xbf16> to vector<32x96xbf16>
    %cst_30 = arith.constant dense<0.000000e+00> : vector<32x256xf32>
    %89 = tpu.matmul %88, %86, %cst_30 {dimension_numbers = #tpu.dot_dimension_numbers<[1], [0], [0], [1], [0, 0, 1, 1], [], []>} : vector<32x96xbf16>, vector<96x256xbf16>, vector<32x256xf32> -> vector<32x256xf32>
    %c1 = arith.constant 1 : index
    %c0_31 = arith.constant 0 : index
    %c0_32 = arith.constant 0 : index
    %90 = vector.load %arg2[%c1, %c0_31, %c0_32] : memref<3x1x128xf32, #tpu.memory_space<vmem>>, vector<1x1x128xf32>
    %91 = vector.shape_cast %90 : vector<1x1x128xf32> to vector<1x128xf32>
    %c1_33 = arith.constant 1 : index
    %c0_34 = arith.constant 0 : index
    %c0_35 = arith.constant 0 : index
    %92 = vector.load %arg3[%c1_33, %c0_34, %c0_35] : memref<3x1x128xf32, #tpu.memory_space<vmem>>, vector<1x1x128xf32>
    %93 = vector.shape_cast %92 : vector<1x1x128xf32> to vector<1x128xf32>
    %94 = vector.extract_strided_slice %89 {offsets = [0, 0], sizes = [32, 128], strides = [1, 1]} : vector<32x256xf32> to vector<32x128xf32>
    %cst_36 = arith.constant 0.000000e+00 : f32
    %95 = vector.shape_cast %2 : vector<1x128xi1> to vector<1x128xi1>
    %96 = vector.broadcast %95 : vector<1x128xi1> to vector<32x128xi1>
    %97 = vector.broadcast %cst_36 : f32 to vector<32x128xf32>
    %98 = arith.select %96, %94, %97 : vector<32x128xi1>, vector<32x128xf32>
    %cst_37 = arith.constant dense<0.000000e+00> : vector<32xf32>
    %99 = vector.multi_reduction <add>, %98, %cst_37 [1] : vector<32x128xf32> to vector<32xf32>
    %100 = vector.shape_cast %99 : vector<32xf32> to vector<32x1xf32>
    %101 = arith.mulf %98, %98 : vector<32x128xf32>
    %cst_38 = arith.constant dense<0.000000e+00> : vector<32xf32>
    %102 = vector.multi_reduction <add>, %101, %cst_38 [1] : vector<32x128xf32> to vector<32xf32>
    %103 = vector.shape_cast %102 : vector<32xf32> to vector<32x1xf32>
    %cst_39 = arith.constant 0.0123456791 : f32
    %104 = vector.broadcast %cst_39 : f32 to vector<32x1xf32>
    %105 = arith.mulf %100, %104 : vector<32x1xf32>
    %cst_40 = arith.constant 0.0123456791 : f32
    %106 = vector.broadcast %cst_40 : f32 to vector<32x1xf32>
    %107 = arith.mulf %103, %106 : vector<32x1xf32>
    %108 = arith.mulf %105, %105 : vector<32x1xf32>
    %109 = arith.subf %107, %108 : vector<32x1xf32>
    %cst_41 = arith.constant 9.99999974E-6 : f32
    %110 = vector.broadcast %cst_41 : f32 to vector<32x1xf32>
    %111 = arith.addf %109, %110 : vector<32x1xf32>
    %112 = math.rsqrt %111 : vector<32x1xf32>
    %113 = vector.broadcast %105 : vector<32x1xf32> to vector<32x128xf32>
    %114 = arith.subf %98, %113 : vector<32x128xf32>
    %115 = vector.broadcast %112 : vector<32x1xf32> to vector<32x128xf32>
    %116 = arith.mulf %114, %115 : vector<32x128xf32>
    %117 = vector.broadcast %91 : vector<1x128xf32> to vector<32x128xf32>
    %118 = arith.mulf %116, %117 : vector<32x128xf32>
    %119 = vector.broadcast %93 : vector<1x128xf32> to vector<32x128xf32>
    %120 = arith.addf %118, %119 : vector<32x128xf32>
    %cst_42 = arith.constant 0.000000e+00 : f32
    %121 = vector.broadcast %cst_42 : f32 to vector<32x128xf32>
    %122 = arith.cmpf oge, %120, %121 : vector<32x128xf32>
    %cst_43 = arith.constant 2.000000e-01 : f32
    %123 = vector.broadcast %cst_43 : f32 to vector<32x128xf32>
    %124 = arith.mulf %123, %120 : vector<32x128xf32>
    %125 = arith.select %122, %120, %124 : vector<32x128xi1>, vector<32x128xf32>
    %cst_44 = arith.constant 0.000000e+00 : f32
    %126 = vector.shape_cast %2 : vector<1x128xi1> to vector<1x128xi1>
    %127 = vector.broadcast %126 : vector<1x128xi1> to vector<32x128xi1>
    %128 = vector.broadcast %cst_44 : f32 to vector<32x128xf32>
    %129 = arith.select %127, %125, %128 : vector<32x128xi1>, vector<32x128xf32>
    %130 = vector.extract_strided_slice %89 {offsets = [0, 128], sizes = [32, 128], strides = [1, 1]} : vector<32x256xf32> to vector<32x128xf32>
    %cst_45 = arith.constant 0.000000e+00 : f32
    %131 = vector.shape_cast %2 : vector<1x128xi1> to vector<1x128xi1>
    %132 = vector.broadcast %131 : vector<1x128xi1> to vector<32x128xi1>
    %133 = vector.broadcast %cst_45 : f32 to vector<32x128xf32>
    %134 = arith.select %132, %130, %133 : vector<32x128xi1>, vector<32x128xf32>
    %cst_46 = arith.constant dense<0.000000e+00> : vector<32xf32>
    %135 = vector.multi_reduction <add>, %134, %cst_46 [1] : vector<32x128xf32> to vector<32xf32>
    %136 = vector.shape_cast %135 : vector<32xf32> to vector<32x1xf32>
    %137 = arith.mulf %134, %134 : vector<32x128xf32>
    %cst_47 = arith.constant dense<0.000000e+00> : vector<32xf32>
    %138 = vector.multi_reduction <add>, %137, %cst_47 [1] : vector<32x128xf32> to vector<32xf32>
    %139 = vector.shape_cast %138 : vector<32xf32> to vector<32x1xf32>
    %cst_48 = arith.constant 0.0123456791 : f32
    %140 = vector.broadcast %cst_48 : f32 to vector<32x1xf32>
    %141 = arith.mulf %136, %140 : vector<32x1xf32>
    %cst_49 = arith.constant 0.0123456791 : f32
    %142 = vector.broadcast %cst_49 : f32 to vector<32x1xf32>
    %143 = arith.mulf %139, %142 : vector<32x1xf32>
    %144 = arith.mulf %141, %141 : vector<32x1xf32>
    %145 = arith.subf %143, %144 : vector<32x1xf32>
    %cst_50 = arith.constant 9.99999974E-6 : f32
    %146 = vector.broadcast %cst_50 : f32 to vector<32x1xf32>
    %147 = arith.addf %145, %146 : vector<32x1xf32>
    %148 = math.rsqrt %147 : vector<32x1xf32>
    %149 = vector.broadcast %141 : vector<32x1xf32> to vector<32x128xf32>
    %150 = arith.subf %134, %149 : vector<32x128xf32>
    %151 = vector.broadcast %148 : vector<32x1xf32> to vector<32x128xf32>
    %152 = arith.mulf %150, %151 : vector<32x128xf32>
    %153 = vector.broadcast %91 : vector<1x128xf32> to vector<32x128xf32>
    %154 = arith.mulf %152, %153 : vector<32x128xf32>
    %155 = vector.broadcast %93 : vector<1x128xf32> to vector<32x128xf32>
    %156 = arith.addf %154, %155 : vector<32x128xf32>
    %cst_51 = arith.constant 0.000000e+00 : f32
    %157 = vector.broadcast %cst_51 : f32 to vector<32x128xf32>
    %158 = arith.cmpf oge, %156, %157 : vector<32x128xf32>
    %cst_52 = arith.constant 2.000000e-01 : f32
    %159 = vector.broadcast %cst_52 : f32 to vector<32x128xf32>
    %160 = arith.mulf %159, %156 : vector<32x128xf32>
    %161 = arith.select %158, %156, %160 : vector<32x128xi1>, vector<32x128xf32>
    %cst_53 = arith.constant 0.000000e+00 : f32
    %162 = vector.shape_cast %2 : vector<1x128xi1> to vector<1x128xi1>
    %163 = vector.broadcast %162 : vector<1x128xi1> to vector<32x128xi1>
    %164 = vector.broadcast %cst_53 : f32 to vector<32x128xf32>
    %165 = arith.select %163, %161, %164 : vector<32x128xi1>, vector<32x128xf32>
    %166 = tpu.concatenate %129, %165 in 1 : vector<32x128xf32>, vector<32x128xf32> -> vector<32x256xf32>
    %c1_i32_54 = arith.constant 1 : i32
    %167 = tpu.dynamic_rotate %166 by %c1_i32_54 dim 1 : vector<32x256xf32>, i32 -> vector<32x256xf32>
    %c255_i32_55 = arith.constant 255 : i32
    %168 = tpu.dynamic_rotate %166 by %c255_i32_55 dim 1 : vector<32x256xf32>, i32 -> vector<32x256xf32>
    %169 = tpu.concatenate %167, %166, %168 in 0 : vector<32x256xf32>, vector<32x256xf32>, vector<32x256xf32> -> vector<96x256xf32>
    %170 = arith.truncf %169 : vector<96x256xf32> to vector<96x256xbf16>
    %c1_56 = arith.constant 1 : index
    %c0_57 = arith.constant 0 : index
    %c0_58 = arith.constant 0 : index
    %171 = vector.load %arg4[%c1_56, %c0_57, %c0_58] : memref<3x32x96xbf16, #tpu.memory_space<vmem>>, vector<1x32x96xbf16>
    %172 = vector.shape_cast %171 : vector<1x32x96xbf16> to vector<32x96xbf16>
    %cst_59 = arith.constant dense<0.000000e+00> : vector<32x256xf32>
    %173 = tpu.matmul %172, %170, %cst_59 {dimension_numbers = #tpu.dot_dimension_numbers<[1], [0], [0], [1], [0, 0, 1, 1], [], []>} : vector<32x96xbf16>, vector<96x256xbf16>, vector<32x256xf32> -> vector<32x256xf32>
    %c2 = arith.constant 2 : index
    %c0_60 = arith.constant 0 : index
    %c0_61 = arith.constant 0 : index
    %174 = vector.load %arg2[%c2, %c0_60, %c0_61] : memref<3x1x128xf32, #tpu.memory_space<vmem>>, vector<1x1x128xf32>
    %175 = vector.shape_cast %174 : vector<1x1x128xf32> to vector<1x128xf32>
    %c2_62 = arith.constant 2 : index
    %c0_63 = arith.constant 0 : index
    %c0_64 = arith.constant 0 : index
    %176 = vector.load %arg3[%c2_62, %c0_63, %c0_64] : memref<3x1x128xf32, #tpu.memory_space<vmem>>, vector<1x1x128xf32>
    %177 = vector.shape_cast %176 : vector<1x1x128xf32> to vector<1x128xf32>
    %178 = vector.extract_strided_slice %173 {offsets = [0, 0], sizes = [32, 128], strides = [1, 1]} : vector<32x256xf32> to vector<32x128xf32>
    %cst_65 = arith.constant 0.000000e+00 : f32
    %179 = vector.shape_cast %2 : vector<1x128xi1> to vector<1x128xi1>
    %180 = vector.broadcast %179 : vector<1x128xi1> to vector<32x128xi1>
    %181 = vector.broadcast %cst_65 : f32 to vector<32x128xf32>
    %182 = arith.select %180, %178, %181 : vector<32x128xi1>, vector<32x128xf32>
    %cst_66 = arith.constant dense<0.000000e+00> : vector<32xf32>
    %183 = vector.multi_reduction <add>, %182, %cst_66 [1] : vector<32x128xf32> to vector<32xf32>
    %184 = vector.shape_cast %183 : vector<32xf32> to vector<32x1xf32>
    %185 = arith.mulf %182, %182 : vector<32x128xf32>
    %cst_67 = arith.constant dense<0.000000e+00> : vector<32xf32>
    %186 = vector.multi_reduction <add>, %185, %cst_67 [1] : vector<32x128xf32> to vector<32xf32>
    %187 = vector.shape_cast %186 : vector<32xf32> to vector<32x1xf32>
    %cst_68 = arith.constant 0.0123456791 : f32
    %188 = vector.broadcast %cst_68 : f32 to vector<32x1xf32>
    %189 = arith.mulf %184, %188 : vector<32x1xf32>
    %cst_69 = arith.constant 0.0123456791 : f32
    %190 = vector.broadcast %cst_69 : f32 to vector<32x1xf32>
    %191 = arith.mulf %187, %190 : vector<32x1xf32>
    %192 = arith.mulf %189, %189 : vector<32x1xf32>
    %193 = arith.subf %191, %192 : vector<32x1xf32>
    %cst_70 = arith.constant 9.99999974E-6 : f32
    %194 = vector.broadcast %cst_70 : f32 to vector<32x1xf32>
    %195 = arith.addf %193, %194 : vector<32x1xf32>
    %196 = math.rsqrt %195 : vector<32x1xf32>
    %197 = vector.broadcast %189 : vector<32x1xf32> to vector<32x128xf32>
    %198 = arith.subf %182, %197 : vector<32x128xf32>
    %199 = vector.broadcast %196 : vector<32x1xf32> to vector<32x128xf32>
    %200 = arith.mulf %198, %199 : vector<32x128xf32>
    %201 = vector.broadcast %175 : vector<1x128xf32> to vector<32x128xf32>
    %202 = arith.mulf %200, %201 : vector<32x128xf32>
    %203 = vector.broadcast %177 : vector<1x128xf32> to vector<32x128xf32>
    %204 = arith.addf %202, %203 : vector<32x128xf32>
    %cst_71 = arith.constant 0.000000e+00 : f32
    %205 = vector.broadcast %cst_71 : f32 to vector<32x128xf32>
    %206 = arith.cmpf oge, %204, %205 : vector<32x128xf32>
    %cst_72 = arith.constant 2.000000e-01 : f32
    %207 = vector.broadcast %cst_72 : f32 to vector<32x128xf32>
    %208 = arith.mulf %207, %204 : vector<32x128xf32>
    %209 = arith.select %206, %204, %208 : vector<32x128xi1>, vector<32x128xf32>
    %cst_73 = arith.constant 0.000000e+00 : f32
    %210 = vector.shape_cast %2 : vector<1x128xi1> to vector<1x128xi1>
    %211 = vector.broadcast %210 : vector<1x128xi1> to vector<32x128xi1>
    %212 = vector.broadcast %cst_73 : f32 to vector<32x128xf32>
    %213 = arith.select %211, %209, %212 : vector<32x128xi1>, vector<32x128xf32>
    %214 = vector.extract_strided_slice %173 {offsets = [0, 128], sizes = [32, 128], strides = [1, 1]} : vector<32x256xf32> to vector<32x128xf32>
    %cst_74 = arith.constant 0.000000e+00 : f32
    %215 = vector.shape_cast %2 : vector<1x128xi1> to vector<1x128xi1>
    %216 = vector.broadcast %215 : vector<1x128xi1> to vector<32x128xi1>
    %217 = vector.broadcast %cst_74 : f32 to vector<32x128xf32>
    %218 = arith.select %216, %214, %217 : vector<32x128xi1>, vector<32x128xf32>
    %cst_75 = arith.constant dense<0.000000e+00> : vector<32xf32>
    %219 = vector.multi_reduction <add>, %218, %cst_75 [1] : vector<32x128xf32> to vector<32xf32>
    %220 = vector.shape_cast %219 : vector<32xf32> to vector<32x1xf32>
    %221 = arith.mulf %218, %218 : vector<32x128xf32>
    %cst_76 = arith.constant dense<0.000000e+00> : vector<32xf32>
    %222 = vector.multi_reduction <add>, %221, %cst_76 [1] : vector<32x128xf32> to vector<32xf32>
    %223 = vector.shape_cast %222 : vector<32xf32> to vector<32x1xf32>
    %cst_77 = arith.constant 0.0123456791 : f32
    %224 = vector.broadcast %cst_77 : f32 to vector<32x1xf32>
    %225 = arith.mulf %220, %224 : vector<32x1xf32>
    %cst_78 = arith.constant 0.0123456791 : f32
    %226 = vector.broadcast %cst_78 : f32 to vector<32x1xf32>
    %227 = arith.mulf %223, %226 : vector<32x1xf32>
    %228 = arith.mulf %225, %225 : vector<32x1xf32>
    %229 = arith.subf %227, %228 : vector<32x1xf32>
    %cst_79 = arith.constant 9.99999974E-6 : f32
    %230 = vector.broadcast %cst_79 : f32 to vector<32x1xf32>
    %231 = arith.addf %229, %230 : vector<32x1xf32>
    %232 = math.rsqrt %231 : vector<32x1xf32>
    %233 = vector.broadcast %225 : vector<32x1xf32> to vector<32x128xf32>
    %234 = arith.subf %218, %233 : vector<32x128xf32>
    %235 = vector.broadcast %232 : vector<32x1xf32> to vector<32x128xf32>
    %236 = arith.mulf %234, %235 : vector<32x128xf32>
    %237 = vector.broadcast %175 : vector<1x128xf32> to vector<32x128xf32>
    %238 = arith.mulf %236, %237 : vector<32x128xf32>
    %239 = vector.broadcast %177 : vector<1x128xf32> to vector<32x128xf32>
    %240 = arith.addf %238, %239 : vector<32x128xf32>
    %cst_80 = arith.constant 0.000000e+00 : f32
    %241 = vector.broadcast %cst_80 : f32 to vector<32x128xf32>
    %242 = arith.cmpf oge, %240, %241 : vector<32x128xf32>
    %cst_81 = arith.constant 2.000000e-01 : f32
    %243 = vector.broadcast %cst_81 : f32 to vector<32x128xf32>
    %244 = arith.mulf %243, %240 : vector<32x128xf32>
    %245 = arith.select %242, %240, %244 : vector<32x128xi1>, vector<32x128xf32>
    %cst_82 = arith.constant 0.000000e+00 : f32
    %246 = vector.shape_cast %2 : vector<1x128xi1> to vector<1x128xi1>
    %247 = vector.broadcast %246 : vector<1x128xi1> to vector<32x128xi1>
    %248 = vector.broadcast %cst_82 : f32 to vector<32x128xf32>
    %249 = arith.select %247, %245, %248 : vector<32x128xi1>, vector<32x128xf32>
    %250 = tpu.concatenate %213, %249 in 1 : vector<32x128xf32>, vector<32x128xf32> -> vector<32x256xf32>
    %c1_i32_83 = arith.constant 1 : i32
    %251 = tpu.dynamic_rotate %250 by %c1_i32_83 dim 1 : vector<32x256xf32>, i32 -> vector<32x256xf32>
    %c255_i32_84 = arith.constant 255 : i32
    %252 = tpu.dynamic_rotate %250 by %c255_i32_84 dim 1 : vector<32x256xf32>, i32 -> vector<32x256xf32>
    %253 = tpu.concatenate %251, %250, %252 in 0 : vector<32x256xf32>, vector<32x256xf32>, vector<32x256xf32> -> vector<96x256xf32>
    %254 = arith.truncf %253 : vector<96x256xf32> to vector<96x256xbf16>
    %c2_85 = arith.constant 2 : index
    %c0_86 = arith.constant 0 : index
    %c0_87 = arith.constant 0 : index
    %255 = vector.load %arg4[%c2_85, %c0_86, %c0_87] : memref<3x32x96xbf16, #tpu.memory_space<vmem>>, vector<1x32x96xbf16>
    %256 = vector.shape_cast %255 : vector<1x32x96xbf16> to vector<32x96xbf16>
    %cst_88 = arith.constant dense<0.000000e+00> : vector<32x256xf32>
    %257 = tpu.matmul %256, %254, %cst_88 {dimension_numbers = #tpu.dot_dimension_numbers<[1], [0], [0], [1], [0, 0, 1, 1], [], []>} : vector<32x96xbf16>, vector<96x256xbf16>, vector<32x256xf32> -> vector<32x256xf32>
    %258 = vector.extract_strided_slice %257 {offsets = [0, 0], sizes = [32, 128], strides = [1, 1]} : vector<32x256xf32> to vector<32x128xf32>
    %c0_89 = arith.constant 0 : index
    %c0_90 = arith.constant 0 : index
    %c0_91 = arith.constant 0 : index
    %259 = vector.load %arg5[%c0_89, %c0_90, %c0_91] : memref<2x32x128xf32, #tpu.memory_space<vmem>>, vector<1x32x128xf32>
    %260 = vector.shape_cast %259 : vector<1x32x128xf32> to vector<32x128xf32>
    %261 = vector.shape_cast %258 : vector<32x128xf32> to vector<1x32x128xf32>
    tpu.vector_store %arg5[%c0_89, %c0_90, %c0_91], %261 {strides = array<i32>} : memref<2x32x128xf32, #tpu.memory_space<vmem>>, vector<1x32x128xf32>,
    %262 = vector.extract_strided_slice %257 {offsets = [0, 128], sizes = [32, 128], strides = [1, 1]} : vector<32x256xf32> to vector<32x128xf32>
    %c1_92 = arith.constant 1 : index
    %c0_93 = arith.constant 0 : index
    %c0_94 = arith.constant 0 : index
    %263 = vector.load %arg5[%c1_92, %c0_93, %c0_94] : memref<2x32x128xf32, #tpu.memory_space<vmem>>, vector<1x32x128xf32>
    %264 = vector.shape_cast %263 : vector<1x32x128xf32> to vector<32x128xf32>
    %265 = vector.shape_cast %262 : vector<32x128xf32> to vector<1x32x128xf32>
    tpu.vector_store %arg5[%c1_92, %c0_93, %c0_94], %265 {strides = array<i32>} : memref<2x32x128xf32, #tpu.memory_space<vmem>>, vector<1x32x128xf32>,
    return
  }
}

</mosaic_0001>

<bundles_post_ra>
// kernel: tgram_forward.1
= control target key start
LH: loop header
LB: loop body
LE: loop exit
PB: predicated region body
PF: predicated region fallthrough
CT: control target
= control target key end

     0   :  { %vm51_vm0 = vcmask 130048   ;;  %s2491_s0 = inlined_call_operand.vmem [shape: bf16[16,256], index: 0, kind: input, shape index: {}]   ;;  %s2492_s1 = inlined_call_operand.vmem [shape: bf16[32,16], index: 1, kind: input, shape index: {}]   ;;  %s2493_s2 = inlined_call_operand.vmem [shape: f32[3,1,128], index: 2, kind: input, shape index: {}]   ;;  %s2494_s3 = inlined_call_operand.vmem [shape: f32[3,1,128], index: 3, kind: input, shape index: {}]   ;;  %s2495_s4 = inlined_call_operand.vmem [shape: bf16[3,32,96], index: 4, kind: input, shape index: {}]   ;;  %s2496_s5 = inlined_call_operand.hbm [shape: f32[2,32,128], index: 5, kind: output, shape index: {}]  }
   0x1   :  { %v1218_v0 = vld [vmem:[%s2491_s0] sm:$0xf]  ;;  %v1315_v1 = vld [vmem:[%s2491_s0 + $0x4] sm:$0xf0]  ;;  %v1314_v2 = vld [vmem:[%s2491_s0 + $0x4] sm:$0xf] }
   0x2   :  { %v1219_v3 = vor.u32 %v1315_v1, %v1218_v0  ;;  %v1220_v4 = vld [vmem:[%s2491_s0 + $0x8] sm:$0xf0]  ;;  %v1312_v6 = vld [vmem:[%s2492_s1] sm:$0xff] }
   0x3   :  { %v1223_v5 = vor.u32 %v1314_v2, %v1220_v4 }
   0x4   :  { %65 = vmatpush.bf16.msra.mxu0 %v1219_v3 }
   0x5   :  { %84 = vmatpush.bf16.msra.mxu1 %v1223_v5 }
   0x6   :  { %10 = vsyncpa [#allocation3], 0  ;;  %v1313_v7 = vld [vmem:[%s2492_s1 + $0x8] sm:$0xff]  ;;  %v22_v8 = vlaneseq  ;;  %s1539_s7 = smov 127   ;;  %s1540_s8 = smov 1  }
   0x7   :  { %1224 = vmatmul.msk.bf16.vlgmr.msra.gmra.mxu0 %vm51_vm0, %v1312_v6  ;;  %s1196_s0 = sshll.u32 %s2496_s5, 4  ;;  %s1542_s1 = smov 128   ;;  %s1197_s0 = int_to_ptr.hbm [resolvable:$true] %s1196_s0 }
   0x8   :  { %1226 = vmatmul.msk.bf16.vlgmr.msra.gmra.mxu1 %vm51_vm0, %v1312_v6  ;;  %v1592_v9 = vand.u32 127, %v22_v8  ;;  %s1543_s30 = smov 8  }
   0xa   :  { %vm24_vm1 = vcmp.lt.s32.totalorder %v1592_v9, 81 }
  0x17   :  { %1225 = vmatmul.msk.bf16.gmra.mxu0 %vm51_vm0, %v1313_v7 }
  0x18   :  { %1227 = vmatmul.msk.bf16.gmra.mxu1 %vm51_vm0, %v1313_v7 }
  0x84   :  { %v67_v10 = vpop.f32.mrf.mxu0 }
  0x85   :  { %v1597_v11 = vsel %vm24_vm1, %v67_v10, 0.0  ;;  %v86_v12 = vpop.f32.mrf.mxu1 }
  0x86   :  { %v1601_v13 = vsel %vm24_vm1, %v86_v12, 0.0  ;;  %104 = vadd.xlane.f32.xlu2 %v1597_v11  ;;  %v112_v14 = vmul.f32 %v1597_v11, %v1597_v11 }
  0x87   :  { %226 = vadd.xlane.f32.xlu1 %v1601_v13  ;;  %v234_v31 = vmul.f32 %v1601_v13, %v1601_v13 }
  0x88   :  { %116 = vadd.xlane.f32.xlu0 %v112_v14 }
  0x8c   :  { %v69_v15 = vpop.f32.mrf.mxu0 }
  0x8d   :  { %v88_v16 = vpop.f32.mrf.mxu1  ;;  %v1613_v18 = vsel %vm24_vm1, %v69_v15, 0.0 }
  0x8e   :  { %v1609_v17 = vsel %vm24_vm1, %v88_v16, 0.0  ;;  %v113_v32 = vmul.f32 %v1613_v18, %v1613_v18 }
  0x8f   :  { %228 = vadd.xlane.f32.xlu2 %v1609_v17  ;;  %v235_v33 = vmul.f32 %v1609_v17, %v1609_v17 }
  0x90   :  { %106 = vadd.xlane.f32.xlu0 %v1613_v18 }
  0x94   :  { %v72_v19 = vpop.f32.mrf.mxu0 }
  0x95   :  { %v1619_v20 = vsel %vm24_vm1, %v72_v19, 0.0  ;;  %v91_v21 = vpop.f32.mrf.mxu1 }
  0x96   :  { %v1623_v22 = vsel %vm24_vm1, %v91_v21, 0.0  ;;  %v114_v23 = vmul.f32 %v1619_v20, %v1619_v20 }
  0x97   :  { %230 = vadd.xlane.f32.xlu1 %v1623_v22  ;;  %v236_v29 = vmul.f32 %v1623_v22, %v1623_v22 }
  0x98   :  { %120 = vadd.xlane.f32.xlu2 %v114_v23  ;;  %108 = vadd.xlane.f32.xlu0 %v1619_v20 }
  0x9c   :  { %v74_v24 = vpop.f32.mrf.mxu0 }
  0x9d   :  { %v1631_v25 = vsel %vm24_vm1, %v74_v24, 0.0  ;;  %v93_v26 = vpop.f32.mrf.mxu1 }
  0x9e   :  { %v1635_v27 = vsel %vm24_vm1, %v93_v26, 0.0  ;;  %v115_v28 = vmul.f32 %v1631_v25, %v1631_v25 }
  0x9f   :  { %232 = vadd.xlane.f32.xlu1 %v1635_v27  ;;  %v237_v30 = vmul.f32 %v1635_v27, %v1635_v27 }
  0xa0   :  { %122 = vadd.xlane.f32.xlu2 %v115_v28  ;;  %242 = vadd.xlane.f32.xlu0 %v236_v29 }
  0xa7   :  { %244 = vadd.xlane.f32.xlu1 %v237_v30 }
  0xa8   :  { %238 = vadd.xlane.f32.xlu2 %v234_v31  ;;  %110 = vadd.xlane.f32.xlu0 %v1631_v25 }
  0xaf   :  { %118 = vadd.xlane.f32.xlu1 %v113_v32 }
  0xb0   :  { %240 = vadd.xlane.f32.xlu0 %v235_v33 }
  0xf9   :  { %v105_v34 = vpop.xlane.xlu2 %104 }
  0xfa   :  { %v1651_v35 = vmul.f32 0.012345679, %v105_v34  ;;  %v227_v39 = vpop.xlane.xlu1 %226 }
  0xfb   :  { %v117_v36 = vpop.xlane.xlu0 %116  ;;  %v1673_v60 = vmul.f32 0.012345679, %v227_v39 }
  0xfc   :  { %v132_v37 = vmul.f32 %v1651_v35, %v1651_v35  ;;  %v128_v38 = vmul.f32 0.012345679, %v117_v36 }
  0xfd   :  { %v254_v3 = vmul.f32 %v1673_v60, %v1673_v60 }
  0xfe   :  { %v136_v40 = vsub.f32 %v128_v38, %v132_v37 }
 0x100   :  { %v1655_v43 = vadd.f32 1e-05, %v136_v40 }
 0x102   :  { %v229_v41 = vpop.xlane.xlu2 %228  ;;  %1465 = vrsqrt.f32 %v1655_v43  ;;  %vm150_vm4 = vweird.f32 %v1655_v43 }
 0x103   :  { %v107_v42 = vpop.xlane.xlu0 %106  ;;  %v1691_v15 = vmul.f32 0.012345679, %v229_v41 }
 0x104   :  { %v1693_v16 = vmul.f32 0.012345679, %v107_v42 }
 0x105   :  { %v255_v34 = vmul.f32 %v1691_v15, %v1691_v15 }
 0x106   :  { %v133_v37 = vmul.f32 %v1693_v16, %v1693_v16 }
 0x108   :  { %v1662_v50 = vpop.eup %1465 }
 0x109   :  { %v145_v55 = vmul.f32 %v1662_v50, %v1655_v43  ;;  %vm151_vm2 = vweird.f32 %v1662_v50 }
 0x10a   :  { %v231_v44 = vpop.xlane.xlu1 %230  ;;  %vm1719_vm5 = vmor %vm150_vm4, %vm151_vm2 }
 0x10b   :  { %v121_v45 = vpop.xlane.xlu2 %120  ;;  %v109_v46 = vpop.xlane.xlu0 %108  ;;  %v1664_v52 = vmul.f32 0.012345679, %v231_v44  ;;  %v146_v61 = vmul.f32 %v1662_v50, %v145_v55 }
 0x10c   :  { %v130_v47 = vmul.f32 0.012345679, %v121_v45  ;;  %v1658_v48 = vmul.f32 0.012345679, %v109_v46 }
 0x10d   :  { %v256_v58 = vmul.f32 %v1664_v52, %v1664_v52  ;;  %v147_v4 = vmul.f32 0.5, %v146_v61 }
 0x10e   :  { %v134_v49 = vmul.f32 %v1658_v48, %v1658_v48 }
 0x10f   :  { %v148_v28 = vsub.f32 1.5, %v147_v4 }
 0x110   :  { %v138_v51 = vsub.f32 %v130_v47, %v134_v49 }
 0x111   :  { %v149_v40 = vmul.f32 %v1662_v50, %v148_v28 }
 0x112   :  { %v1666_v53 = vadd.f32 1e-05, %v138_v51  ;;  %v233_v54 = vpop.xlane.xlu1 %232 }
 0x113   :  { %v123_v56 = vpop.xlane.xlu2 %122  ;;  %v243_v57 = vpop.xlane.xlu0 %242  ;;  %v1676_v63 = vmul.f32 0.012345679, %v233_v54  ;;  %v153_v43 = vsel %vm1719_vm5, %v1662_v50, %v149_v40 }
 0x114   :  { %1467 = vrsqrt.f32 %v1666_v53  ;;  %v252_v59 = vmul.f32 0.012345679, %v243_v57  ;;  %v131_v21 = vmul.f32 0.012345679, %v123_v56  ;;  %vm170_vm6 = vweird.f32 %v1666_v53 }
 0x115   :  { %v257_v8 = vmul.f32 %v1676_v63, %v1676_v63  ;;  %v184_v56 = vsub.f32 %v1597_v11, %v1651_v35  ;;  %v186_v35 = vsub.f32 %v1619_v20, %v1658_v48 }
 0x116   :  { %v260_v62 = vsub.f32 %v252_v59, %v256_v58 }
 0x118   :  { %v1678_v0 = vadd.f32 1e-05, %v260_v62 }
 0x11a   :  { %v1680_v1 = vpop.eup %1467  ;;  %v245_v2 = vpop.xlane.xlu1 %244  ;;  %1469 = vrsqrt.f32 %v1678_v0  ;;  %vm292_vm9 = vweird.f32 %v1678_v0 }
 0x11b   :  { %v165_v5 = vmul.f32 %v1680_v1, %v1666_v53  ;;  %v239_v6 = vpop.xlane.xlu2 %238  ;;  %v111_v7 = vpop.xlane.xlu0 %110  ;;  %v253_v10 = vmul.f32 0.012345679, %v245_v2  ;;  %vm171_vm3 = vweird.f32 %v1680_v1  ;;  %v188_v2 = vmul.f32 %v184_v56, %v153_v43 }
 0x11c   :  { %v250_v12 = vmul.f32 0.012345679, %v239_v6  ;;  %v1689_v14 = vmul.f32 0.012345679, %v111_v7  ;;  %vm1731_vm7 = vmor %vm170_vm6, %vm171_vm3  ;;  %v308_v6 = vsub.f32 %v1623_v22, %v1664_v52 }
 0x11d   :  { %v166_v19 = vmul.f32 %v1680_v1, %v165_v5  ;;  %v261_v23 = vsub.f32 %v253_v10, %v257_v8 }
 0x11e   :  { %v258_v24 = vsub.f32 %v250_v12, %v254_v3  ;;  %v135_v26 = vmul.f32 %v1689_v14, %v1689_v14  ;;  %v1748_v3 = vld [vmem:[%s2493_s2] ss:$0 sm:$0xff]  ;;  %v306_v12 = vsub.f32 %v1601_v13, %v1673_v60  ;;  %v309_v60 = vsub.f32 %v1635_v27, %v1676_v63 }
 0x11f   :  { %v167_v29 = vmul.f32 0.5, %v166_v19  ;;  %v1698_v30 = vadd.f32 1e-05, %v261_v23  ;;  %v195_v23 = vmul.f32 %v1748_v3, %v188_v2 }
 0x120   :  { %v1700_v31 = vadd.f32 1e-05, %v258_v24  ;;  %v139_v32 = vsub.f32 %v131_v21, %v135_v26  ;;  %v1470_v33 = vpop.eup %1469  ;;  %v185_v21 = vsub.f32 %v1613_v18, %v1693_v16  ;;  %v1765_v24 = vld [vmem:[%s2494_s3] ss:$0 sm:$0xff] }
 0x121   :  { %v168_v36 = vsub.f32 1.5, %v167_v29  ;;  %v287_v38 = vmul.f32 %v1470_v33, %v1678_v0  ;;  %1471 = vrsqrt.f32 %v1698_v30  ;;  %vm293_vm8 = vweird.f32 %v1470_v33 }
 0x122   :  { %v119_v39 = vpop.xlane.xlu1 %118  ;;  %1473 = vrsqrt.f32 %v1700_v31  ;;  %v1712_v41 = vadd.f32 1e-05, %v139_v32  ;;  %vm294_vm10 = vmor %vm292_vm9, %vm293_vm8  ;;  %vm302_vm13 = vweird.f32 %v1698_v30  ;;  %vm272_vm14 = vweird.f32 %v1700_v31 }
 0x123   :  { %v241_v42 = vpop.xlane.xlu0 %240  ;;  %v169_v44 = vmul.f32 %v1680_v1, %v168_v36  ;;  %v288_v45 = vmul.f32 %v1470_v33, %v287_v38  ;;  %v129_v46 = vmul.f32 0.012345679, %v119_v39 }
 0x124   :  { %v251_v47 = vmul.f32 0.012345679, %v241_v42  ;;  %1475 = vrsqrt.f32 %v1712_v41  ;;  %vm180_vm3 = vweird.f32 %v1712_v41 }
 0x125   :  { %v289_v51 = vmul.f32 0.5, %v288_v45  ;;  %v137_v54 = vsub.f32 %v129_v46, %v133_v37  ;;  %v173_v53 = vsel %vm1731_vm7, %v1680_v1, %v169_v44 }
 0x126   :  { %v259_v55 = vsub.f32 %v251_v47, %v255_v34  ;;  %v190_v20 = vmul.f32 %v186_v35, %v173_v53  ;;  %v187_v47 = vsub.f32 %v1631_v25, %v1689_v14 }
 0x127   :  { %v1472_v58 = vpop.eup %1471  ;;  %v290_v59 = vsub.f32 1.5, %v289_v51  ;;  %v1738_v61 = vadd.f32 1e-05, %v137_v54 }
 0x128   :  { %v1474_v11 = vpop.eup %1473  ;;  %v297_v50 = vmul.f32 %v1472_v58, %v1698_v30  ;;  %v1743_v62 = vadd.f32 1e-05, %v259_v55  ;;  %v197_v26 = vmul.f32 %v1748_v3, %v190_v20  ;;  %vm303_vm11 = vweird.f32 %v1472_v58 }
 0x129   :  { %v291_v4 = vmul.f32 %v1470_v33, %v290_v59  ;;  %v267_v1 = vmul.f32 %v1474_v11, %v1700_v31  ;;  %1477 = vrsqrt.f32 %v1738_v61  ;;  %vm273_vm12 = vweird.f32 %v1474_v11  ;;  %vm304_vm15 = vmor %vm302_vm13, %vm303_vm11 }
 0x12a   :  { %v1476_v5 = vpop.eup %1475  ;;  %v298_v48 = vmul.f32 %v1472_v58, %v297_v50  ;;  %1479 = vrsqrt.f32 %v1743_v62  ;;  %v204_v27 = vadd.f32 %v1765_v24, %v197_v26  ;;  %vm274_vm2 = vmor %vm272_vm14, %vm273_vm12  ;;  %v1779_v30 = vadd.f32 %v1765_v24, %v195_v23 }
 0x12b   :  { %v295_v7 = vsel %vm294_vm10, %v1470_v33, %v291_v4  ;;  %v268_v8 = vmul.f32 %v1474_v11, %v267_v1  ;;  %v175_v10 = vmul.f32 %v1476_v5, %v1712_v41  ;;  %vm181_vm0 = vweird.f32 %v1476_v5 }
 0x12c   :  { %v312_v19 = vmul.f32 %v308_v6, %v295_v7  ;;  %v299_v0 = vmul.f32 0.5, %v298_v48  ;;  %vm182_vm4 = vmor %vm180_vm3, %vm181_vm0  ;;  %vm208_vm6 = vcmp.ge.f32.partialorder %v204_v27, 0.0  ;;  %v212_v57 = vmul.f32 0.2, %v204_v27 }
 0x12d   :  { %v269_v22 = vmul.f32 0.5, %v268_v8  ;;  %v176_v52 = vmul.f32 %v1476_v5, %v175_v10  ;;  %vm160_vm8 = vweird.f32 %v1738_v61  ;;  %vm282_vm9 = vweird.f32 %v1743_v62 }
 0x12e   :  { %v300_v28 = vsub.f32 1.5, %v299_v0  ;;  %v316_v13 = vmul.f32 %v1748_v3, %v312_v19  ;;  %v1794_v1 = vsel %vm208_vm6, %v204_v27, %v212_v57  ;;  %v307_v10 = vsub.f32 %v1609_v17, %v1691_v15 }
 0x12f   :  { %v270_v29 = vsub.f32 1.5, %v269_v22  ;;  %v177_v32 = vmul.f32 0.5, %v176_v52  ;;  %v1478_v33 = vpop.eup %1477  ;;  %v210_v0 = vmul.f32 0.2, %v1779_v30  ;;  %v220_v15 = vsel %vm24_vm1, %v1794_v1, 0.0 }
 0x130   :  { %v301_v34 = vmul.f32 %v1472_v58, %v300_v28  ;;  %v320_v36 = vadd.f32 %v1765_v24, %v316_v13  ;;  %v155_v39 = vmul.f32 %v1478_v33, %v1738_v61  ;;  %v1480_v40 = vpop.eup %1479  ;;  %vm161_vm7 = vweird.f32 %v1478_v33 }
 0x131   :  { %v271_v37 = vmul.f32 %v1474_v11, %v270_v29  ;;  %v178_v38 = vsub.f32 1.5, %v177_v32  ;;  %v277_v49 = vmul.f32 %v1480_v40, %v1743_v62  ;;  %vm162_vm11 = vmor %vm160_vm8, %vm161_vm7  ;;  %vm283_vm12 = vweird.f32 %v1480_v40 }
 0x132   :  { %v305_v63 = vsel %vm304_vm15, %v1472_v58, %v301_v34  ;;  %v156_v45 = vmul.f32 %v1478_v33, %v155_v39  ;;  %v328_v51 = vmul.f32 0.2, %v320_v36  ;;  %vm324_vm5 = vcmp.ge.f32.partialorder %v320_v36, 0.0  ;;  %vm284_vm14 = vmor %vm282_vm9, %vm283_vm12 }
 0x133   :  { %v313_v31 = vmul.f32 %v309_v60, %v305_v63  ;;  %v275_v42 = vsel %vm274_vm2, %v1474_v11, %v271_v37  ;;  %v179_v44 = vmul.f32 %v1476_v5, %v178_v38  ;;  %v278_v43 = vmul.f32 %v1480_v40, %v277_v49 }
 0x134   :  { %v310_v46 = vmul.f32 %v306_v12, %v275_v42  ;;  %v157_v55 = vmul.f32 0.5, %v156_v45  ;;  %v1789_v11 = vsel %vm324_vm5, %v320_v36, %v328_v51  ;;  %vm206_vm15 = vcmp.ge.f32.partialorder %v1779_v30, 0.0  ;;  %vm1879_vm5 = vmpackc.low %vm24_vm1, %vm24_vm1 }
 0x135   :  { %v183_v54 = vsel %vm182_vm4, %v1476_v5, %v179_v44  ;;  %v317_v56 = vmul.f32 %v1748_v3, %v313_v31  ;;  %v279_v14 = vmul.f32 0.5, %v278_v43  ;;  %v336_v61 = vsel %vm24_vm1, %v1789_v11, 0.0 }
 0x136   :  { %v191_v41 = vmul.f32 %v187_v47, %v183_v54  ;;  %v158_v58 = vsub.f32 1.5, %v157_v55  ;;  %v314_v59 = vmul.f32 %v1748_v3, %v310_v46  ;;  %v1830_v13 = vsel %vm206_vm15, %v1779_v30, %v210_v0 }
 0x137   :  { %v321_v53 = vadd.f32 %v1765_v24, %v317_v56  ;;  %v280_v4 = vsub.f32 1.5, %v279_v14  ;;  %v218_v34 = vsel %vm24_vm1, %v1830_v13, 0.0  ;;  %vm379_vm4 = vcmp.lt.s32.totalorder %v1592_v9, 127 }
 0x138   :  { %v198_v25 = vmul.f32 %v1748_v3, %v191_v41  ;;  %v159_v35 = vmul.f32 %v1478_v33, %v158_v58  ;;  %v318_v20 = vadd.f32 %v1765_v24, %v314_v59  ;;  %vm354_vm6 = vcmp.lt.s32.totalorder %v1592_v9, 1 }
 0x139   :  { %vm325_vm10 = vcmp.ge.f32.partialorder %v321_v53, 0.0  ;;  %v329_v50 = vmul.f32 0.2, %v321_v53  ;;  %v281_v7 = vmul.f32 %v1480_v40, %v280_v4  ;;  %vm414_vm7 = vcmask 785408  }
 0x13a   :  { %v205_v2 = vadd.f32 %v1765_v24, %v198_v25  ;;  %v163_v5 = vsel %vm162_vm11, %v1478_v33, %v159_v35  ;;  %v326_v23 = vmul.f32 0.2, %v318_v20  ;;  %vm322_vm0 = vcmp.ge.f32.partialorder %v318_v20, 0.0 }
 0x13b   :  { %v1796_v6 = vsel %vm325_vm10, %v321_v53, %v329_v50  ;;  %v189_v48 = vmul.f32 %v185_v21, %v163_v5  ;;  %v285_v22 = vsel %vm284_vm14, %v1480_v40, %v281_v7 }
 0x13c   :  { %v337_v8 = vsel %vm24_vm1, %v1796_v6, 0.0  ;;  %vm209_vm13 = vcmp.ge.f32.partialorder %v205_v2, 0.0  ;;  %v213_v19 = vmul.f32 0.2, %v205_v2  ;;  %v1245_v16 = vpack.c.bf16 %v1796_v6, %v1789_v11 }
 0x13d   :  { %v1349_v12 = vpack.i.bf16 %v337_v8, %v336_v61  ;;  %v196_v18 = vmul.f32 %v1748_v3, %v189_v48  ;;  %v311_v21 = vmul.f32 %v307_v10, %v285_v22  ;;  %v1840_v36 = vsel %vm322_vm0, %v318_v20, %v326_v23 }
 0x13e   :  { %v1818_v17 = vsel %vm209_vm13, %v205_v2, %v213_v19 }
 0x13f   :  { %1350 = vrot.lane.b32.xlu2 %v1349_v12, %s1539_s7  ;;  %v221_v62 = vsel %vm24_vm1, %v1818_v17, 0.0  ;;  %v203_v52 = vadd.f32 %v1765_v24, %v196_v18  ;;  %v1237_v26 = vpack.c.bf16 %v1818_v17, %v1794_v1  ;;  %v315_v60 = vmul.f32 %v1748_v3, %v311_v21 }
 0x140   :  { %v1339_v28 = vpack.i.bf16 %v221_v62, %v220_v15 }
 0x141   :  { %vm207_vm2 = vcmp.ge.f32.partialorder %v203_v52, 0.0  ;;  %v211_v29 = vmul.f32 0.2, %v203_v52  ;;  %v319_v32 = vadd.f32 %v1765_v24, %v315_v60  ;;  %v334_v24 = vsel %vm24_vm1, %v1840_v36, 0.0 }
 0x142   :  { %1340 = vrot.lane.b32.xlu1 %v1339_v28, %s1539_s7 }
 0x143   :  { %v1835_v33 = vsel %vm207_vm2, %v203_v52, %v211_v29  ;;  %vm323_vm3 = vcmp.ge.f32.partialorder %v319_v32, 0.0  ;;  %v327_v3 = vmul.f32 0.2, %v319_v32  ;;  %v1316_v29 = vld [vmem:[%s2495_s4] sm:$0xff] }
 0x144   :  { %v219_v37 = vsel %vm24_vm1, %v1835_v33, 0.0  ;;  %v1240_v38 = vpack.c.bf16 %v1835_v33, %v1830_v13 }
 0x145   :  { %v1344_v39 = vpack.i.bf16 %v219_v37, %v218_v34  ;;  %v331_v40 = vsel %vm323_vm3, %v319_v32, %v327_v3  ;;  %v1317_v32 = vld [vmem:[%s2495_s4 + $0x8] sm:$0xff] }
 0x146   :  { %v335_v27 = vsel %vm24_vm1, %v331_v40, 0.0  ;;  %v1248_v63 = vpack.c.bf16 %v331_v40, %v1840_v36 }
 0x147   :  { %1345 = vrot.lane.b32.xlu0 %v1344_v39, %s1539_s7  ;;  %v1354_v30 = vpack.i.bf16 %v335_v27, %v334_v24 }
 0x149   :  { %1355 = vrot.lane.b32.xlu2 %v1354_v30, %s1539_s7 }
 0x14a   :  { %1360 = vrot.lane.b32.xlu1 %v1339_v28, %s1540_s8 }
 0x14f   :  { %1365 = vrot.lane.b32.xlu0 %v1349_v12, %s1540_s8 }
 0x151   :  { %1370 = vrot.lane.b32.xlu2 %v1344_v39, %s1540_s8 }
 0x152   :  { %1375 = vrot.lane.b32.xlu1 %v1354_v30, %s1540_s8 }
 0x199   :  { %v1351_v31 = vpop.permute.xlu2 %1350 }
 0x19a   :  { %v1353_v44 = vunpack.i.h.bf16 %v1351_v31  ;;  %v1352_v45 = vunpack.i.l.bf16 %v1351_v31 }
 0x1a3   :  { %v1356_v49 = vpop.permute.xlu2 %1355 }
 0x1a4   :  { %v1358_v58 = vunpack.i.h.bf16 %v1356_v49  ;;  %v1357_v53 = vunpack.i.l.bf16 %v1356_v49 }
 0x1ab   :  { %v1371_v0 = vpop.permute.xlu2 %1370 }
 0x1ac   :  { %v1373_v11 = vunpack.i.h.bf16 %v1371_v0  ;;  %v1372_v6 = vunpack.i.l.bf16 %v1371_v0 }
 0x1b4   :  { %v1341_v42 = vpop.permute.xlu1 %1340 }
 0x1b5   :  { %v1343_v46 = vunpack.i.h.bf16 %v1341_v42  ;;  %v1342_v47 = vunpack.i.l.bf16 %v1341_v42 }
 0x1b7   :  { %v382_v51 = vsel %vm379_vm4, %v1342_v47, %v1352_v45  ;;  %v383_v54 = vsel %vm379_vm4, %v1343_v46, %v1353_v44  ;;  %v386_v55 = vsel %vm379_vm4, %v1352_v45, %v1342_v47  ;;  %v387_v56 = vsel %vm379_vm4, %v1353_v44, %v1343_v46 }
 0x1b8   :  { %v398_v41 = vpack.c.bf16 %v383_v54, %v382_v51  ;;  %v399_v43 = vpack.c.bf16 %v387_v56, %v386_v55 }
 0x1b9   :  { %v1346_v57 = vpop.permute.xlu0 %1345 }
 0x1ba   :  { %v1348_v59 = vunpack.i.h.bf16 %v1346_v57  ;;  %v1347_v25 = vunpack.i.l.bf16 %v1346_v57  ;;  %423 = vmatpush.bf16.msra.mxu2 %v398_v41  ;;  %442 = vmatpush.bf16.msra.mxu3 %v399_v43 }
 0x1bc   :  { %v1361_v14 = vpop.permute.xlu1 %1360  ;;  %v380_v35 = vsel %vm379_vm4, %v1347_v25, %v1357_v53  ;;  %v381_v50 = vsel %vm379_vm4, %v1348_v59, %v1358_v58  ;;  %v384_v2 = vsel %vm379_vm4, %v1357_v53, %v1347_v25  ;;  %v385_v4 = vsel %vm379_vm4, %v1358_v58, %v1348_v59 }
 0x1bd   :  { %v396_v5 = vpack.c.bf16 %v381_v50, %v380_v35  ;;  %v397_v61 = vpack.c.bf16 %v385_v4, %v384_v2  ;;  %v1363_v10 = vunpack.i.h.bf16 %v1361_v14  ;;  %v1362_v12 = vunpack.i.l.bf16 %v1361_v14 }
 0x1bf   :  { %424 = vmatpush.bf16.msra.mxu2 %v396_v5  ;;  %443 = vmatpush.bf16.msra.mxu3 %v397_v61 }
 0x1c1   :  { %v1366_v48 = vpop.permute.xlu0 %1365 }
 0x1c2   :  { %v1368_v7 = vunpack.i.h.bf16 %v1366_v48  ;;  %v1367_v8 = vunpack.i.l.bf16 %v1366_v48 }
 0x1c3   :  { %1238 = vmatpush.bf16.msk.msra.mxu2 %vm1879_vm5, %v1237_v26  ;;  %1246 = vmatpush.bf16.msk.msra.mxu3 %vm1879_vm5, %v1245_v16 }
 0x1c4   :  { %v1376_v19 = vpop.permute.xlu1 %1375  ;;  %v361_v22 = vsel %vm354_vm6, %v1367_v8, %v1362_v12  ;;  %v362_v18 = vsel %vm354_vm6, %v1368_v7, %v1363_v10  ;;  %v357_v1 = vsel %vm354_vm6, %v1362_v12, %v1367_v8  ;;  %v358_v17 = vsel %vm354_vm6, %v1363_v10, %v1368_v7 }
 0x1c5   :  { %v1378_v21 = vunpack.i.h.bf16 %v1376_v19  ;;  %v1377_v15 = vunpack.i.l.bf16 %v1376_v19  ;;  %v390_v16 = vpack.c.bf16 %v362_v18, %v361_v22  ;;  %v391_v62 = vpack.c.bf16 %v358_v17, %v357_v1 }
 0x1c7   :  { %1241 = vmatpush.bf16.msk.msra.mxu2 %vm1879_vm5, %v1240_v38  ;;  %1249 = vmatpush.bf16.msk.msra.mxu3 %vm1879_vm5, %v1248_v63  ;;  %v359_v52 = vsel %vm354_vm6, %v1377_v15, %v1372_v6  ;;  %v360_v23 = vsel %vm354_vm6, %v1378_v21, %v1373_v11  ;;  %v355_v26 = vsel %vm354_vm6, %v1372_v6, %v1377_v15 }
 0x1c8   :  { %v356_v28 = vsel %vm354_vm6, %v1373_v11, %v1378_v21  ;;  %v388_v13 = vpack.c.bf16 %v360_v23, %v359_v52 }
 0x1c9   :  { %v389_v60 = vpack.c.bf16 %v356_v28, %v355_v26 }
 0x1cb   :  { %427 = vmatpush.bf16.msra.mxu2 %v390_v16  ;;  %446 = vmatpush.bf16.msra.mxu3 %v391_v62 }
 0x1cf   :  { %428 = vmatpush.bf16.msra.mxu2 %v388_v13  ;;  %447 = vmatpush.bf16.msra.mxu3 %v389_v60 }
 0x1d2   :  { %1242 = vmatmul.msk.bf16.vlgmr.msra.gmra.mxu2 %vm414_vm7, %v1316_v29  ;;  %1250 = vmatmul.msk.bf16.vlgmr.msra.gmra.mxu3 %vm414_vm7, %v1316_v29 }
 0x1e2   :  { %1243 = vmatmul.msk.bf16.gmra.mxu2 %vm414_vm7, %v1317_v32  ;;  %1251 = vmatmul.msk.bf16.gmra.mxu3 %vm414_vm7, %v1317_v32 }
 0x255   :  { %v430_v33 = vpop.f32.mrf.mxu2  ;;  %v449_v34 = vpop.f32.mrf.mxu3 }
 0x256   :  { %v1926_v36 = vsel %vm24_vm1, %v430_v33, 0.0  ;;  %v1930_v37 = vsel %vm24_vm1, %v449_v34, 0.0 }
 0x257   :  { %589 = vadd.xlane.f32.xlu2 %v1930_v37  ;;  %467 = vadd.xlane.f32.xlu1 %v1926_v36  ;;  %v475_v3 = vmul.f32 %v1926_v36, %v1926_v36  ;;  %v597_v55 = vmul.f32 %v1930_v37, %v1930_v37 }
 0x259   :  { %479 = vadd.xlane.f32.xlu0 %v475_v3 }
 0x25d   :  { %v432_v38 = vpop.f32.mrf.mxu2  ;;  %v451_v39 = vpop.f32.mrf.mxu3 }
 0x25e   :  { %v1938_v40 = vsel %vm24_vm1, %v451_v39, 0.0  ;;  %v1943_v24 = vsel %vm24_vm1, %v432_v38, 0.0 }
 0x25f   :  { %591 = vadd.xlane.f32.xlu1 %v1938_v40  ;;  %v598_v56 = vmul.f32 %v1938_v40, %v1938_v40  ;;  %v476_v41 = vmul.f32 %v1943_v24, %v1943_v24 }
 0x261   :  { %469 = vadd.xlane.f32.xlu0 %v1943_v24 }
 0x265   :  { %v435_v27 = vpop.f32.mrf.mxu2  ;;  %v454_v63 = vpop.f32.mrf.mxu3 }
 0x266   :  { %v1948_v30 = vsel %vm24_vm1, %v435_v27, 0.0  ;;  %v1952_v31 = vsel %vm24_vm1, %v454_v63, 0.0 }
 0x267   :  { %593 = vadd.xlane.f32.xlu1 %v1952_v31  ;;  %v477_v42 = vmul.f32 %v1948_v30, %v1948_v30  ;;  %v599_v45 = vmul.f32 %v1952_v31, %v1952_v31 }
 0x269   :  { %471 = vadd.xlane.f32.xlu0 %v1948_v30  ;;  %483 = vadd.xlane.f32.xlu2 %v477_v42 }
 0x26d   :  { %v437_v44 = vpop.f32.mrf.mxu2  ;;  %v456_v49 = vpop.f32.mrf.mxu3 }
 0x26e   :  { %v1962_v46 = vsel %vm24_vm1, %v437_v44, 0.0  ;;  %v1969_v51 = vsel %vm24_vm1, %v456_v49, 0.0 }
 0x26f   :  { %v478_v47 = vmul.f32 %v1962_v46, %v1962_v46  ;;  %v600_v54 = vmul.f32 %v1969_v51, %v1969_v51 }
 0x271   :  { %605 = vadd.xlane.f32.xlu0 %v599_v45  ;;  %473 = vadd.xlane.f32.xlu2 %v1962_v46 }
 0x272   :  { %485 = vadd.xlane.f32.xlu1 %v478_v47 }
 0x279   :  { %595 = vadd.xlane.f32.xlu0 %v1969_v51  ;;  %607 = vadd.xlane.f32.xlu2 %v600_v54 }
 0x27a   :  { %601 = vadd.xlane.f32.xlu1 %v597_v55 }
 0x281   :  { %603 = vadd.xlane.f32.xlu0 %v598_v56  ;;  %481 = vadd.xlane.f32.xlu2 %v476_v41 }
 0x2ca   :  { %v468_v43 = vpop.xlane.xlu1 %467  ;;  %v590_v14 = vpop.xlane.xlu2 %589 }
 0x2cb   :  { %v1980_v57 = vmul.f32 0.012345679, %v468_v43  ;;  %v2007_v13 = vmul.f32 0.012345679, %v590_v14 }
 0x2cc   :  { %v480_v58 = vpop.xlane.xlu0 %479 }
 0x2cd   :  { %v495_v53 = vmul.f32 %v1980_v57, %v1980_v57  ;;  %v491_v59 = vmul.f32 0.012345679, %v480_v58  ;;  %v617_v39 = vmul.f32 %v2007_v13, %v2007_v13 }
 0x2cf   :  { %v499_v35 = vsub.f32 %v491_v59, %v495_v53 }
 0x2d1   :  { %v1984_v2 = vadd.f32 1e-05, %v499_v35 }
 0x2d2   :  { %v592_v25 = vpop.xlane.xlu1 %591 }
 0x2d3   :  { %1481 = vrsqrt.f32 %v1984_v2  ;;  %v2016_v42 = vmul.f32 0.012345679, %v592_v25  ;;  %vm513_vm12 = vweird.f32 %v1984_v2 }
 0x2d4   :  { %v470_v50 = vpop.xlane.xlu0 %469 }
 0x2d5   :  { %v2018_v44 = vmul.f32 0.012345679, %v470_v50  ;;  %v618_v59 = vmul.f32 %v2016_v42, %v2016_v42 }
 0x2d7   :  { %v496_v25 = vmul.f32 %v2018_v44, %v2018_v44 }
 0x2d9   :  { %v1993_v19 = vpop.eup %1481 }
 0x2da   :  { %v594_v61 = vpop.xlane.xlu1 %593  ;;  %v508_v15 = vmul.f32 %v1993_v19, %v1984_v2  ;;  %vm514_vm9 = vweird.f32 %v1993_v19 }
 0x2db   :  { %v1991_v10 = vmul.f32 0.012345679, %v594_v61  ;;  %vm2049_vm13 = vmor %vm513_vm12, %vm514_vm9 }
 0x2dc   :  { %v472_v4 = vpop.xlane.xlu0 %471  ;;  %v484_v5 = vpop.xlane.xlu2 %483  ;;  %v509_v52 = vmul.f32 %v1993_v19, %v508_v15  ;;  %v547_v15 = vsub.f32 %v1926_v36, %v1980_v57 }
 0x2dd   :  { %v1987_v48 = vmul.f32 0.012345679, %v472_v4  ;;  %v493_v8 = vmul.f32 0.012345679, %v484_v5  ;;  %v619_v0 = vmul.f32 %v1991_v10, %v1991_v10  ;;  %v671_v57 = vsub.f32 %v1952_v31, %v1991_v10 }
 0x2de   :  { %v510_v34 = vmul.f32 0.5, %v509_v52 }
 0x2df   :  { %v497_v7 = vmul.f32 %v1987_v48, %v1987_v48 }
 0x2e0   :  { %v511_v56 = vsub.f32 1.5, %v510_v34 }
 0x2e1   :  { %v501_v12 = vsub.f32 %v493_v8, %v497_v7  ;;  %v549_v8 = vsub.f32 %v1948_v30, %v1987_v48  ;;  %v2045_v30 = vld [vmem:[%s2493_s2 + $0x1] ss:$0 sm:$0xff] }
 0x2e2   :  { %v512_v7 = vmul.f32 %v1993_v19, %v511_v56 }
 0x2e3   :  { %v505_v22 = vadd.f32 1e-05, %v501_v12 }
 0x2e4   :  { %v606_v18 = vpop.xlane.xlu0 %605  ;;  %v474_v21 = vpop.xlane.xlu2 %473  ;;  %v516_v36 = vsel %vm2049_vm13, %v1993_v19, %v512_v7 }
 0x2e5   :  { %1483 = vrsqrt.f32 %v505_v22  ;;  %v615_v1 = vmul.f32 0.012345679, %v606_v18  ;;  %v486_v17 = vpop.xlane.xlu1 %485  ;;  %v1999_v11 = vmul.f32 0.012345679, %v474_v21  ;;  %vm533_vm10 = vweird.f32 %v505_v22 }
 0x2e6   :  { %v494_v62 = vmul.f32 0.012345679, %v486_v17 }
 0x2e7   :  { %v623_v6 = vsub.f32 %v615_v1, %v619_v0  ;;  %v498_v16 = vmul.f32 %v1999_v11, %v1999_v11 }
 0x2e9   :  { %v2004_v23 = vadd.f32 1e-05, %v623_v6  ;;  %v502_v26 = vsub.f32 %v494_v62, %v498_v16 }
 0x2eb   :  { %v1484_v28 = vpop.eup %1483  ;;  %1485 = vrsqrt.f32 %v2004_v23  ;;  %v2009_v29 = vadd.f32 1e-05, %v502_v26  ;;  %v2062_v26 = vld [vmem:[%s2494_s3 + $0x1] ss:$0 sm:$0xff]  ;;  %vm655_vm15 = vweird.f32 %v2004_v23 }
 0x2ec   :  { %v528_v60 = vmul.f32 %v1484_v28, %v505_v22  ;;  %v596_v32 = vpop.xlane.xlu0 %595  ;;  %v608_v33 = vpop.xlane.xlu2 %607  ;;  %vm534_vm8 = vweird.f32 %v1484_v28 }
 0x2ed   :  { %v2011_v3 = vmul.f32 0.012345679, %v596_v32  ;;  %v602_v38 = vpop.xlane.xlu1 %601  ;;  %1487 = vrsqrt.f32 %v2009_v29  ;;  %v616_v47 = vmul.f32 0.012345679, %v608_v33  ;;  %vm535_vm11 = vmor %vm533_vm10, %vm534_vm8  ;;  %vm543_vm3 = vweird.f32 %v2009_v29 }
 0x2ee   :  { %v529_v27 = vmul.f32 %v1484_v28, %v528_v60  ;;  %v613_v63 = vmul.f32 0.012345679, %v602_v38  ;;  %v551_v38 = vmul.f32 %v547_v15, %v516_v36 }
 0x2ef   :  { %v620_v45 = vmul.f32 %v2011_v3, %v2011_v3 }
 0x2f0   :  { %v530_v49 = vmul.f32 0.5, %v529_v27  ;;  %v621_v54 = vsub.f32 %v613_v63, %v617_v39 }
 0x2f1   :  { %v1486_v55 = vpop.eup %1485  ;;  %v624_v41 = vsub.f32 %v616_v47, %v620_v45  ;;  %v550_v47 = vsub.f32 %v1962_v46, %v1999_v11 }
 0x2f2   :  { %v531_v43 = vsub.f32 1.5, %v530_v49  ;;  %v650_v58 = vmul.f32 %v1486_v55, %v2004_v23  ;;  %v2023_v53 = vadd.f32 1e-05, %v621_v54  ;;  %vm656_vm14 = vweird.f32 %v1486_v55 }
 0x2f3   :  { %v2030_v14 = vadd.f32 1e-05, %v624_v41  ;;  %v1488_v35 = vpop.eup %1487  ;;  %vm657_vm0 = vmor %vm655_vm15, %vm656_vm14 }
 0x2f4   :  { %v532_v50 = vmul.f32 %v1484_v28, %v531_v43  ;;  %v651_v4 = vmul.f32 %v1486_v55, %v650_v58  ;;  %1489 = vrsqrt.f32 %v2023_v53  ;;  %v604_v5 = vpop.xlane.xlu0 %603  ;;  %v482_v61 = vpop.xlane.xlu2 %481  ;;  %v538_v12 = vmul.f32 %v1488_v35, %v2009_v29 }
 0x2f5   :  { %1491 = vrsqrt.f32 %v2030_v14  ;;  %v614_v21 = vmul.f32 0.012345679, %v604_v5  ;;  %v492_v22 = vmul.f32 0.012345679, %v482_v61  ;;  %vm544_vm2 = vweird.f32 %v1488_v35 }
 0x2f6   :  { %v536_v0 = vsel %vm535_vm11, %v1484_v28, %v532_v50  ;;  %v652_v18 = vmul.f32 0.5, %v651_v4  ;;  %v539_v17 = vmul.f32 %v1488_v35, %v538_v12  ;;  %vm545_vm8 = vmor %vm543_vm3, %vm544_vm2  ;;  %v672_v4 = vsub.f32 %v1969_v51, %v2011_v3 }
 0x2f7   :  { %v553_v1 = vmul.f32 %v549_v8, %v536_v0  ;;  %v622_v16 = vsub.f32 %v614_v21, %v618_v59  ;;  %v500_v62 = vsub.f32 %v492_v22, %v496_v25  ;;  %v669_v59 = vsub.f32 %v1930_v37, %v2007_v13 }
 0x2f8   :  { %v653_v6 = vsub.f32 1.5, %v652_v18  ;;  %v540_v2 = vmul.f32 0.5, %v539_v17  ;;  %v558_v25 = vmul.f32 %v2045_v30, %v551_v38  ;;  %vm635_vm12 = vweird.f32 %v2023_v53 }
 0x2f9   :  { %v560_v52 = vmul.f32 %v2045_v30, %v553_v1  ;;  %v2065_v32 = vadd.f32 1e-05, %v622_v16  ;;  %v2067_v33 = vadd.f32 1e-05, %v500_v62  ;;  %vm665_vm13 = vweird.f32 %v2030_v14 }
 0x2fa   :  { %v1490_v28 = vpop.eup %1489  ;;  %v654_v60 = vmul.f32 %v1486_v55, %v653_v6  ;;  %v541_v34 = vsub.f32 1.5, %v540_v2 }
 0x2fb   :  { %v1492_v19 = vpop.eup %1491  ;;  %v630_v31 = vmul.f32 %v1490_v28, %v2023_v53  ;;  %v567_v10 = vadd.f32 %v2062_v26, %v560_v52  ;;  %1493 = vrsqrt.f32 %v2065_v32  ;;  %vm636_vm10 = vweird.f32 %v1490_v28 }
 0x2fc   :  { %v658_v39 = vsel %vm657_vm0, %v1486_v55, %v654_v60  ;;  %v660_v27 = vmul.f32 %v1492_v19, %v2030_v14  ;;  %v542_v23 = vmul.f32 %v1488_v35, %v541_v34  ;;  %1495 = vrsqrt.f32 %v2067_v33  ;;  %vm637_vm14 = vmor %vm635_vm12, %vm636_vm10 }
 0x2fd   :  { %v675_v63 = vmul.f32 %v671_v57, %v658_v39  ;;  %v631_v45 = vmul.f32 %v1490_v28, %v630_v31  ;;  %vm571_vm9 = vcmp.ge.f32.partialorder %v567_v10, 0.0  ;;  %v575_v55 = vmul.f32 0.2, %v567_v10 }
 0x2fe   :  { %v661_v49 = vmul.f32 %v1492_v19, %v660_v27  ;;  %v546_v54 = vsel %vm545_vm8, %v1488_v35, %v542_v23  ;;  %vm666_vm11 = vweird.f32 %v1492_v19  ;;  %vm645_vm8 = vweird.f32 %v2065_v32 }
 0x2ff   :  { %v632_v56 = vmul.f32 0.5, %v631_v45  ;;  %v554_v41 = vmul.f32 %v550_v47, %v546_v54  ;;  %v679_v58 = vmul.f32 %v2045_v30, %v675_v63  ;;  %v2082_v35 = vsel %vm571_vm9, %v567_v10, %v575_v55  ;;  %vm667_vm15 = vmor %vm665_vm13, %vm666_vm11 }
 0x300   :  { %v662_v43 = vmul.f32 0.5, %v661_v49  ;;  %v583_v51 = vsel %vm24_vm1, %v2082_v35, 0.0  ;;  %v670_v34 = vsub.f32 %v1938_v40, %v2016_v42  ;;  %vm523_vm11 = vweird.f32 %v2067_v33 }
 0x301   :  { %v633_v29 = vsub.f32 1.5, %v632_v56  ;;  %v1494_v46 = vpop.eup %1493  ;;  %v561_v50 = vmul.f32 %v2045_v30, %v554_v41  ;;  %v683_v8 = vadd.f32 %v2062_v26, %v679_v58  ;;  %v548_v39 = vsub.f32 %v1943_v24, %v2018_v44 }
 0x302   :  { %v663_v11 = vsub.f32 1.5, %v662_v43  ;;  %v640_v61 = vmul.f32 %v1494_v46, %v2065_v32  ;;  %v1496_v37 = vpop.eup %1495  ;;  %vm646_vm2 = vweird.f32 %v1494_v46  ;;  %v565_v40 = vadd.f32 %v2062_v26, %v558_v25 }
 0x303   :  { %v634_v5 = vmul.f32 %v1490_v28, %v633_v29  ;;  %v568_v7 = vadd.f32 %v2062_v26, %v561_v50  ;;  %v518_v18 = vmul.f32 %v1496_v37, %v2067_v33  ;;  %vm687_vm3 = vcmp.ge.f32.partialorder %v683_v8, 0.0  ;;  %vm647_vm10 = vmor %vm645_vm8, %vm646_vm2 }
 0x304   :  { %v664_v13 = vmul.f32 %v1492_v19, %v663_v11  ;;  %v641_v0 = vmul.f32 %v1494_v46, %v640_v61  ;;  %v691_v17 = vmul.f32 0.2, %v683_v8  ;;  %vm524_vm9 = vweird.f32 %v1496_v37 }
 0x305   :  { %v638_v12 = vsel %vm637_vm14, %v1490_v28, %v634_v5  ;;  %vm572_vm0 = vcmp.ge.f32.partialorder %v568_v7, 0.0  ;;  %v576_v21 = vmul.f32 0.2, %v568_v7  ;;  %v519_v15 = vmul.f32 %v1496_v37, %v518_v18  ;;  %vm525_vm13 = vmor %vm523_vm11, %vm524_vm9 }
 0x306   :  { %v668_v3 = vsel %vm667_vm15, %v1492_v19, %v664_v13  ;;  %v673_v53 = vmul.f32 %v669_v59, %v638_v12  ;;  %v642_v14 = vmul.f32 0.5, %v641_v0  ;;  %v2113_v32 = vsel %vm687_vm3, %v683_v8, %v691_v17 }
 0x307   :  { %v676_v22 = vmul.f32 %v672_v4, %v668_v3  ;;  %v2095_v1 = vsel %vm572_vm0, %v568_v7, %v576_v21  ;;  %v520_v16 = vmul.f32 0.5, %v519_v15  ;;  %v699_v33 = vsel %vm24_vm1, %v2113_v32, 0.0 }
 0x308   :  { %v677_v48 = vmul.f32 %v2045_v30, %v673_v53  ;;  %v643_v6 = vsub.f32 1.5, %v642_v14  ;;  %v584_v62 = vsel %vm24_vm1, %v2095_v1, 0.0  ;;  %v1267_v2 = vpack.c.bf16 %v2095_v1, %v2082_v35 }
 0x309   :  { %v680_v36 = vmul.f32 %v2045_v30, %v676_v22  ;;  %v1379_v57 = vpack.i.bf16 %v584_v62, %v583_v51  ;;  %v521_v28 = vsub.f32 1.5, %v520_v16  ;;  %v573_v56 = vmul.f32 0.2, %v565_v40 }
 0x30a   :  { %v644_v52 = vmul.f32 %v1494_v46, %v643_v6  ;;  %v681_v19 = vadd.f32 %v2062_v26, %v677_v48  ;;  %vm569_vm15 = vcmp.ge.f32.partialorder %v565_v40, 0.0 }
 0x30b   :  { %v684_v60 = vadd.f32 %v2062_v26, %v680_v36  ;;  %1380 = vrot.lane.b32.xlu2 %v1379_v57, %s1539_s7  ;;  %v522_v10 = vmul.f32 %v1496_v37, %v521_v28  ;;  %v577_v29 = vsel %vm569_vm15, %v565_v40, %v573_v56 }
 0x30c   :  { %v648_v31 = vsel %vm647_vm10, %v1494_v46, %v644_v52  ;;  %v689_v23 = vmul.f32 0.2, %v681_v19  ;;  %vm685_vm14 = vcmp.ge.f32.partialorder %v681_v19, 0.0 }
 0x30d   :  { %vm688_vm12 = vcmp.ge.f32.partialorder %v684_v60, 0.0  ;;  %v692_v38 = vmul.f32 0.2, %v684_v60  ;;  %v674_v27 = vmul.f32 %v670_v34, %v648_v31  ;;  %v526_v42 = vsel %vm525_vm13, %v1496_v37, %v522_v10 }
 0x30e   :  { %v552_v45 = vmul.f32 %v548_v39, %v526_v42  ;;  %v2134_v58 = vsel %vm685_vm14, %v681_v19, %v689_v23 }
 0x30f   :  { %v2119_v63 = vsel %vm688_vm12, %v684_v60, %v692_v38  ;;  %v678_v24 = vmul.f32 %v2045_v30, %v674_v27 }
 0x310   :  { %v700_v47 = vsel %vm24_vm1, %v2119_v63, 0.0  ;;  %v1275_v44 = vpack.c.bf16 %v2119_v63, %v2113_v32  ;;  %v559_v54 = vmul.f32 %v2045_v30, %v552_v45  ;;  %v697_v30 = vsel %vm24_vm1, %v2134_v58, 0.0 }
 0x311   :  { %v1384_v49 = vpack.i.bf16 %v700_v47, %v699_v33  ;;  %v682_v55 = vadd.f32 %v2062_v26, %v678_v24 }
 0x312   :  { %v566_v41 = vadd.f32 %v2062_v26, %v559_v54  ;;  %v581_v26 = vsel %vm24_vm1, %v577_v29, 0.0 }
 0x313   :  { %1385 = vrot.lane.b32.xlu1 %v1384_v49, %s1539_s7  ;;  %vm686_vm0 = vcmp.ge.f32.partialorder %v682_v55, 0.0  ;;  %v690_v43 = vmul.f32 0.2, %v682_v55 }
 0x314   :  { %vm570_vm2 = vcmp.ge.f32.partialorder %v566_v41, 0.0  ;;  %v574_v59 = vmul.f32 0.2, %v566_v41 }
 0x315   :  { %v694_v25 = vsel %vm686_vm0, %v682_v55, %v690_v43  ;;  %v1318_v43 = vld [vmem:[%s2495_s4 + $0x10] sm:$0xff] }
 0x316   :  { %v698_v46 = vsel %vm24_vm1, %v694_v25, 0.0  ;;  %v1278_v11 = vpack.c.bf16 %v694_v25, %v2134_v58  ;;  %v578_v50 = vsel %vm570_vm2, %v566_v41, %v574_v59  ;;  %v1319_v58 = vld [vmem:[%s2495_s4 + $0x18] sm:$0xff] }
 0x317   :  { %v1394_v4 = vpack.i.bf16 %v698_v46, %v697_v30  ;;  %v582_v5 = vsel %vm24_vm1, %v578_v50, 0.0  ;;  %v1270_v61 = vpack.c.bf16 %v578_v50, %v577_v29 }
 0x318   :  { %v1389_v37 = vpack.i.bf16 %v582_v5, %v581_v26 }
 0x319   :  { %1395 = vrot.lane.b32.xlu2 %v1394_v4, %s1539_s7 }
 0x31a   :  { %1390 = vrot.lane.b32.xlu0 %v1389_v37, %s1539_s7 }
 0x31b   :  { %1405 = vrot.lane.b32.xlu1 %v1384_v49, %s1540_s8 }
 0x321   :  { %1410 = vrot.lane.b32.xlu2 %v1389_v37, %s1540_s8 }
 0x322   :  { %1400 = vrot.lane.b32.xlu0 %v1379_v57, %s1540_s8 }
 0x32a   :  { %1415 = vrot.lane.b32.xlu0 %v1394_v4, %s1540_s8 }
 0x365   :  { %v1381_v13 = vpop.permute.xlu2 %1380 }
 0x366   :  { %v1383_v8 = vunpack.i.h.bf16 %v1381_v13  ;;  %v1382_v12 = vunpack.i.l.bf16 %v1381_v13 }
 0x373   :  { %v1396_v15 = vpop.permute.xlu2 %1395 }
 0x374   :  { %v1398_v48 = vunpack.i.h.bf16 %v1396_v15  ;;  %v1397_v6 = vunpack.i.l.bf16 %v1396_v15 }
 0x385   :  { %v1386_v7 = vpop.permute.xlu1 %1385 }
 0x386   :  { %v1388_v0 = vunpack.i.h.bf16 %v1386_v7  ;;  %v1387_v18 = vunpack.i.l.bf16 %v1386_v7 }
 0x388   :  { %v743_v51 = vsel %vm379_vm4, %v1382_v12, %v1387_v18  ;;  %v744_v3 = vsel %vm379_vm4, %v1383_v8, %v1388_v0  ;;  %v747_v53 = vsel %vm379_vm4, %v1387_v18, %v1382_v12  ;;  %v748_v21 = vsel %vm379_vm4, %v1388_v0, %v1383_v8 }
 0x389   :  { %v759_v22 = vpack.c.bf16 %v744_v3, %v743_v51  ;;  %v760_v14 = vpack.c.bf16 %v748_v21, %v747_v53 }
 0x38b   :  { %784 = vmatpush.bf16.msrb.mxu0 %v759_v22  ;;  %803 = vmatpush.bf16.msrb.mxu1 %v760_v14 }
 0x38c   :  { %v1391_v17 = vpop.permute.xlu0 %1390 }
 0x38d   :  { %v1393_v16 = vunpack.i.h.bf16 %v1391_v17  ;;  %v1392_v62 = vunpack.i.l.bf16 %v1391_v17  ;;  %v1406_v34 = vpop.permute.xlu1 %1405 }
 0x38e   :  { %v1408_v39 = vunpack.i.h.bf16 %v1406_v34  ;;  %v1407_v27 = vunpack.i.l.bf16 %v1406_v34 }
 0x38f   :  { %v741_v36 = vsel %vm379_vm4, %v1392_v62, %v1397_v6  ;;  %v742_v57 = vsel %vm379_vm4, %v1393_v16, %v1398_v48  ;;  %v745_v52 = vsel %vm379_vm4, %v1397_v6, %v1392_v62  ;;  %v746_v28 = vsel %vm379_vm4, %v1398_v48, %v1393_v16 }
 0x390   :  { %v757_v60 = vpack.c.bf16 %v742_v57, %v741_v36  ;;  %v758_v19 = vpack.c.bf16 %v746_v28, %v745_v52 }
 0x392   :  { %785 = vmatpush.bf16.msrb.mxu0 %v757_v60  ;;  %804 = vmatpush.bf16.msrb.mxu1 %v758_v19 }
 0x394   :  { %v1401_v31 = vpop.permute.xlu0 %1400 }
 0x395   :  { %v1403_v10 = vunpack.i.h.bf16 %v1401_v31  ;;  %v1402_v38 = vunpack.i.l.bf16 %v1401_v31 }
 0x396   :  { %1268 = vmatpush.bf16.msk.msrb.mxu0 %vm1879_vm5, %v1267_v2  ;;  %1276 = vmatpush.bf16.msk.msrb.mxu1 %vm1879_vm5, %v1275_v44  ;;  %v1411_v2 = vpop.permute.xlu2 %1410 }
 0x397   :  { %v723_v40 = vsel %vm354_vm6, %v1407_v27, %v1402_v38  ;;  %v724_v42 = vsel %vm354_vm6, %v1408_v39, %v1403_v10  ;;  %v719_v35 = vsel %vm354_vm6, %v1402_v38, %v1407_v27  ;;  %v720_v1 = vsel %vm354_vm6, %v1403_v10, %v1408_v39 }
 0x398   :  { %v751_v63 = vpack.c.bf16 %v724_v42, %v723_v40  ;;  %v752_v33 = vpack.c.bf16 %v720_v1, %v719_v35  ;;  %v1413_v23 = vunpack.i.h.bf16 %v1411_v2  ;;  %v1412_v45 = vunpack.i.l.bf16 %v1411_v2 }
 0x39a   :  { %1271 = vmatpush.bf16.msk.msrb.mxu0 %vm1879_vm5, %v1270_v61  ;;  %1279 = vmatpush.bf16.msk.msrb.mxu1 %vm1879_vm5, %v1278_v11 }
 0x39c   :  { %v1416_v32 = vpop.permute.xlu0 %1415 }
 0x39d   :  { %v1418_v47 = vunpack.i.h.bf16 %v1416_v32  ;;  %v1417_v24 = vunpack.i.l.bf16 %v1416_v32 }
 0x39e   :  { %788 = vmatpush.bf16.msrb.mxu0 %v751_v63  ;;  %807 = vmatpush.bf16.msrb.mxu1 %v752_v33 }
 0x39f   :  { %v721_v44 = vsel %vm354_vm6, %v1417_v24, %v1412_v45  ;;  %v722_v49 = vsel %vm354_vm6, %v1418_v47, %v1413_v23  ;;  %v717_v54 = vsel %vm354_vm6, %v1412_v45, %v1417_v24  ;;  %v718_v56 = vsel %vm354_vm6, %v1413_v23, %v1418_v47 }
 0x3a0   :  { %v749_v55 = vpack.c.bf16 %v722_v49, %v721_v44  ;;  %v750_v41 = vpack.c.bf16 %v718_v56, %v717_v54 }
 0x3a2   :  { %789 = vmatpush.bf16.msrb.mxu0 %v749_v55  ;;  %808 = vmatpush.bf16.msrb.mxu1 %v750_v41 }
 0x3a5   :  { %1272 = vmatmul.msk.bf16.vlgmr.msrb.gmra.mxu0 %vm414_vm7, %v1318_v43  ;;  %1280 = vmatmul.msk.bf16.vlgmr.msrb.gmra.mxu1 %vm414_vm7, %v1318_v43 }
 0x3b5   :  { %1273 = vmatmul.msk.bf16.gmra.mxu0 %vm414_vm7, %v1319_v58  ;;  %1281 = vmatmul.msk.bf16.gmra.mxu1 %vm414_vm7, %v1319_v58 }
 0x422   :  { %v791_v59 = vpop.f32.mrf.mxu0  ;;  %v810_v29 = vpop.f32.mrf.mxu1 }
 0x423   :  { %v2210_v25 = vsel %vm24_vm1, %v791_v59, 0.0  ;;  %v2214_v30 = vsel %vm24_vm1, %v810_v29, 0.0 }
 0x424   :  { %950 = vadd.xlane.f32.xlu2 %v2214_v30  ;;  %828 = vadd.xlane.f32.xlu0 %v2210_v25  ;;  %v836_v46 = vmul.f32 %v2210_v25, %v2210_v25  ;;  %v958_v21 = vmul.f32 %v2214_v30, %v2214_v30 }
 0x426   :  { %840 = vadd.xlane.f32.xlu1 %v836_v46 }
 0x42a   :  { %v793_v11 = vpop.f32.mrf.mxu0  ;;  %v812_v50 = vpop.f32.mrf.mxu1 }
 0x42b   :  { %v2222_v4 = vsel %vm24_vm1, %v812_v50, 0.0  ;;  %v2227_v26 = vsel %vm24_vm1, %v793_v11, 0.0 }
 0x42c   :  { %952 = vadd.xlane.f32.xlu0 %v2222_v4  ;;  %v959_v22 = vmul.f32 %v2222_v4, %v2222_v4  ;;  %v837_v14 = vmul.f32 %v2227_v26, %v2227_v26 }
 0x42e   :  { %830 = vadd.xlane.f32.xlu1 %v2227_v26 }
 0x432   :  { %v796_v5 = vpop.f32.mrf.mxu0  ;;  %v815_v61 = vpop.f32.mrf.mxu1 }
 0x433   :  { %v2232_v37 = vsel %vm24_vm1, %v796_v5, 0.0  ;;  %v2236_v13 = vsel %vm24_vm1, %v815_v61, 0.0 }
 0x434   :  { %954 = vadd.xlane.f32.xlu0 %v2236_v13  ;;  %v838_v7 = vmul.f32 %v2232_v37, %v2232_v37  ;;  %v960_v12 = vmul.f32 %v2236_v13, %v2236_v13 }
 0x436   :  { %832 = vadd.xlane.f32.xlu1 %v2232_v37  ;;  %844 = vadd.xlane.f32.xlu2 %v838_v7 }
 0x43a   :  { %v798_v8 = vpop.f32.mrf.mxu0  ;;  %v817_v51 = vpop.f32.mrf.mxu1 }
 0x43b   :  { %v2246_v0 = vsel %vm24_vm1, %v798_v8, 0.0  ;;  %v2253_v3 = vsel %vm24_vm1, %v817_v51, 0.0 }
 0x43c   :  { %v839_v18 = vmul.f32 %v2246_v0, %v2246_v0  ;;  %v961_v53 = vmul.f32 %v2253_v3, %v2253_v3 }
 0x43e   :  { %966 = vadd.xlane.f32.xlu1 %v960_v12  ;;  %834 = vadd.xlane.f32.xlu2 %v2246_v0 }
 0x43f   :  { %846 = vadd.xlane.f32.xlu0 %v839_v18 }
 0x446   :  { %956 = vadd.xlane.f32.xlu1 %v2253_v3  ;;  %968 = vadd.xlane.f32.xlu2 %v961_v53 }
 0x447   :  { %962 = vadd.xlane.f32.xlu0 %v958_v21 }
 0x44e   :  { %964 = vadd.xlane.f32.xlu1 %v959_v22  ;;  %842 = vadd.xlane.f32.xlu2 %v837_v14 }
 0x497   :  { %v829_v15 = vpop.xlane.xlu0 %828  ;;  %v951_v57 = vpop.xlane.xlu2 %950 }
 0x498   :  { %v2264_v17 = vmul.f32 0.012345679, %v829_v15  ;;  %v2291_v41 = vmul.f32 0.012345679, %v951_v57 }
 0x499   :  { %v841_v48 = vpop.xlane.xlu1 %840 }
 0x49a   :  { %v856_v6 = vmul.f32 %v2264_v17, %v2264_v17  ;;  %v852_v16 = vmul.f32 0.012345679, %v841_v48  ;;  %v978_v50 = vmul.f32 %v2291_v41, %v2291_v41 }
 0x49c   :  { %v860_v62 = vsub.f32 %v852_v16, %v856_v6 }
 0x49e   :  { %v2268_v28 = vadd.f32 1e-05, %v860_v62 }
 0x49f   :  { %v953_v36 = vpop.xlane.xlu0 %952 }
 0x4a0   :  { %1497 = vrsqrt.f32 %v2268_v28  ;;  %v2300_v8 = vmul.f32 0.012345679, %v953_v36  ;;  %vm874_vm3 = vweird.f32 %v2268_v28 }
 0x4a1   :  { %v831_v52 = vpop.xlane.xlu1 %830 }
 0x4a2   :  { %v2305_v22 = vmul.f32 0.012345679, %v831_v52  ;;  %v979_v62 = vmul.f32 %v2300_v8, %v2300_v8 }
 0x4a6   :  { %v2275_v39 = vpop.eup %1497 }
 0x4a7   :  { %v955_v34 = vpop.xlane.xlu0 %954  ;;  %v869_v42 = vmul.f32 %v2275_v39, %v2268_v28  ;;  %vm875_vm9 = vweird.f32 %v2275_v39 }
 0x4a8   :  { %v2277_v27 = vmul.f32 0.012345679, %v955_v34  ;;  %vm2328_vm12 = vmor %vm874_vm3, %vm875_vm9 }
 0x4a9   :  { %v833_v60 = vpop.xlane.xlu1 %832  ;;  %v845_v19 = vpop.xlane.xlu2 %844  ;;  %v870_v45 = vmul.f32 %v2275_v39, %v869_v42 }
 0x4aa   :  { %v2271_v31 = vmul.f32 0.012345679, %v833_v60  ;;  %v854_v10 = vmul.f32 0.012345679, %v845_v19  ;;  %v980_v35 = vmul.f32 %v2277_v27, %v2277_v27 }
 0x4ab   :  { %v871_v55 = vmul.f32 0.5, %v870_v45 }
 0x4ac   :  { %v858_v38 = vmul.f32 %v2271_v31, %v2271_v31 }
 0x4ad   :  { %v872_v7 = vsub.f32 1.5, %v871_v55 }
 0x4ae   :  { %v862_v40 = vsub.f32 %v854_v10, %v858_v38  ;;  %v857_v10 = vmul.f32 %v2305_v22, %v2305_v22  ;;  %v910_v38 = vsub.f32 %v2232_v37, %v2271_v31 }
 0x4af   :  { %v873_v16 = vmul.f32 %v2275_v39, %v872_v7 }
 0x4b0   :  { %v866_v1 = vadd.f32 1e-05, %v862_v40 }
 0x4b1   :  { %v967_v2 = vpop.xlane.xlu1 %966  ;;  %v835_v32 = vpop.xlane.xlu2 %834  ;;  %v877_v37 = vsel %vm2328_vm12, %v2275_v39, %v873_v16 }
 0x4b2   :  { %1499 = vrsqrt.f32 %v866_v1  ;;  %v976_v63 = vmul.f32 0.012345679, %v967_v2  ;;  %v847_v33 = vpop.xlane.xlu0 %846  ;;  %v2283_v23 = vmul.f32 0.012345679, %v835_v32  ;;  %vm894_vm10 = vweird.f32 %v866_v1 }
 0x4b3   :  { %v855_v44 = vmul.f32 0.012345679, %v847_v33  ;;  %v2338_v33 = vld [vmem:[%s2493_s2 + $0x2] ss:$0 sm:$0xff] }
 0x4b4   :  { %v984_v47 = vsub.f32 %v976_v63, %v980_v35  ;;  %v859_v24 = vmul.f32 %v2283_v23, %v2283_v23 }
 0x4b6   :  { %v2288_v49 = vadd.f32 1e-05, %v984_v47  ;;  %v863_v54 = vsub.f32 %v855_v44, %v859_v24  ;;  %v908_v24 = vsub.f32 %v2210_v25, %v2264_v17  ;;  %v1032_v44 = vsub.f32 %v2236_v13, %v2277_v27  ;;  %v2354_v13 = vld [vmem:[%s2494_s3 + $0x2] ss:$0 sm:$0xff] }
 0x4b8   :  { %v1500_v56 = vpop.eup %1499  ;;  %1501 = vrsqrt.f32 %v2288_v49  ;;  %v2293_v58 = vadd.f32 1e-05, %v863_v54  ;;  %vm1016_vm14 = vweird.f32 %v2288_v49 }
 0x4b9   :  { %v889_v43 = vmul.f32 %v1500_v56, %v866_v1  ;;  %v957_v59 = vpop.xlane.xlu1 %956  ;;  %v969_v29 = vpop.xlane.xlu2 %968  ;;  %vm895_vm8 = vweird.f32 %v1500_v56 }
 0x4ba   :  { %v2295_v46 = vmul.f32 0.012345679, %v957_v59  ;;  %v963_v11 = vpop.xlane.xlu0 %962  ;;  %1503 = vrsqrt.f32 %v2293_v58  ;;  %v977_v18 = vmul.f32 0.012345679, %v969_v29  ;;  %vm896_vm11 = vmor %vm894_vm10, %vm895_vm8  ;;  %vm904_vm2 = vweird.f32 %v2293_v58 }
 0x4bb   :  { %v890_v5 = vmul.f32 %v1500_v56, %v889_v43  ;;  %v974_v61 = vmul.f32 0.012345679, %v963_v11  ;;  %v912_v11 = vmul.f32 %v908_v24, %v877_v37 }
 0x4bc   :  { %v981_v12 = vmul.f32 %v2295_v46, %v2295_v46 }
 0x4bd   :  { %v891_v51 = vmul.f32 0.5, %v890_v5  ;;  %v982_v53 = vsub.f32 %v974_v61, %v978_v50 }
 0x4be   :  { %v1502_v21 = vpop.eup %1501  ;;  %v985_v14 = vsub.f32 %v977_v18, %v981_v12  ;;  %v911_v12 = vsub.f32 %v2246_v0, %v2283_v23 }
 0x4bf   :  { %v892_v15 = vsub.f32 1.5, %v891_v51  ;;  %v1011_v48 = vmul.f32 %v1502_v21, %v2288_v49  ;;  %v2308_v6 = vadd.f32 1e-05, %v982_v53  ;;  %vm1017_vm13 = vweird.f32 %v1502_v21 }
 0x4c0   :  { %v2314_v36 = vadd.f32 1e-05, %v985_v14  ;;  %v1504_v57 = vpop.eup %1503  ;;  %vm1018_vm15 = vmor %vm1016_vm14, %vm1017_vm13 }
 0x4c1   :  { %v893_v60 = vmul.f32 %v1500_v56, %v892_v15  ;;  %v1012_v52 = vmul.f32 %v1502_v21, %v1011_v48  ;;  %1505 = vrsqrt.f32 %v2308_v6  ;;  %v965_v19 = vpop.xlane.xlu1 %964  ;;  %v843_v34 = vpop.xlane.xlu2 %842  ;;  %v899_v40 = vmul.f32 %v1504_v57, %v2293_v58 }
 0x4c2   :  { %1507 = vrsqrt.f32 %v2314_v36  ;;  %v975_v2 = vmul.f32 0.012345679, %v965_v19  ;;  %v853_v32 = vmul.f32 0.012345679, %v843_v34  ;;  %vm905_vm0 = vweird.f32 %v1504_v57 }
 0x4c3   :  { %v897_v35 = vsel %vm896_vm11, %v1500_v56, %v893_v60  ;;  %v1013_v1 = vmul.f32 0.5, %v1012_v52  ;;  %v900_v63 = vmul.f32 %v1504_v57, %v899_v40  ;;  %vm906_vm3 = vmor %vm904_vm2, %vm905_vm0  ;;  %v1030_v58 = vsub.f32 %v2214_v30, %v2291_v41 }
 0x4c4   :  { %v914_v31 = vmul.f32 %v910_v38, %v897_v35  ;;  %v983_v45 = vsub.f32 %v975_v2, %v979_v62  ;;  %v861_v47 = vsub.f32 %v853_v32, %v857_v10  ;;  %v919_v62 = vmul.f32 %v2338_v33, %v912_v11 }
 0x4c5   :  { %v1014_v28 = vsub.f32 1.5, %v1013_v1  ;;  %v901_v54 = vmul.f32 0.5, %v900_v63  ;;  %vm996_vm11 = vweird.f32 %v2308_v6  ;;  %vm1026_vm12 = vweird.f32 %v2314_v36 }
 0x4c6   :  { %v921_v39 = vmul.f32 %v2338_v33, %v914_v31  ;;  %v2346_v43 = vadd.f32 1e-05, %v983_v45  ;;  %v2348_v59 = vadd.f32 1e-05, %v861_v47  ;;  %v909_v11 = vsub.f32 %v2227_v26, %v2305_v22 }
 0x4c7   :  { %v1506_v56 = vpop.eup %1505  ;;  %v1015_v55 = vmul.f32 %v1502_v21, %v1014_v28  ;;  %v902_v50 = vsub.f32 1.5, %v901_v54 }
 0x4c8   :  { %v1508_v29 = vpop.eup %1507  ;;  %v991_v25 = vmul.f32 %v1506_v56, %v2308_v6  ;;  %1509 = vrsqrt.f32 %v2346_v43  ;;  %v928_v7 = vadd.f32 %v2354_v13, %v921_v39  ;;  %vm997_vm8 = vweird.f32 %v1506_v56 }
 0x4c9   :  { %v1019_v17 = vsel %vm1018_vm15, %v1502_v21, %v1015_v55  ;;  %v1021_v27 = vmul.f32 %v1508_v29, %v2314_v36  ;;  %v903_v5 = vmul.f32 %v1504_v57, %v902_v50  ;;  %1511 = vrsqrt.f32 %v2348_v59  ;;  %vm998_vm13 = vmor %vm996_vm11, %vm997_vm8 }
 0x4ca   :  { %v1036_v49 = vmul.f32 %v1032_v44, %v1019_v17  ;;  %v992_v61 = vmul.f32 %v1506_v56, %v991_v25  ;;  %v936_v16 = vmul.f32 0.2, %v928_v7  ;;  %vm1027_vm9 = vweird.f32 %v1508_v29 }
 0x4cb   :  { %v1022_v18 = vmul.f32 %v1508_v29, %v1021_v27  ;;  %v907_v51 = vsel %vm906_vm3, %v1504_v57, %v903_v5  ;;  %vm932_vm10 = vcmp.ge.f32.partialorder %v928_v7, 0.0  ;;  %v1033_v57 = vsub.f32 %v2253_v3, %v2295_v46  ;;  %vm1028_vm14 = vmor %vm1026_vm12, %vm1027_vm9 }
 0x4cc   :  { %v993_v53 = vmul.f32 0.5, %v992_v61  ;;  %v915_v21 = vmul.f32 %v911_v12, %v907_v51  ;;  %v1040_v15 = vmul.f32 %v2338_v33, %v1036_v49  ;;  %v940_v46 = vsel %vm932_vm10, %v928_v7, %v936_v16 }
 0x4cd   :  { %v1023_v14 = vmul.f32 0.5, %v1022_v18  ;;  %v926_v36 = vadd.f32 %v2354_v13, %v919_v62  ;;  %v944_v31 = vsel %vm24_vm1, %v940_v46, 0.0  ;;  %vm1006_vm3 = vweird.f32 %v2346_v43 }
 0x4ce   :  { %v994_v48 = vsub.f32 1.5, %v993_v53  ;;  %v1510_v60 = vpop.eup %1509  ;;  %v922_v23 = vmul.f32 %v2338_v33, %v915_v21  ;;  %v1044_v10 = vadd.f32 %v2354_v13, %v1040_v15  ;;  %vm884_vm10 = vweird.f32 %v2348_v59 }
 0x4cf   :  { %v1024_v0 = vsub.f32 1.5, %v1023_v14  ;;  %v1001_v30 = vmul.f32 %v1510_v60, %v2346_v43  ;;  %v1512_v41 = vpop.eup %1511  ;;  %vm1007_vm0 = vweird.f32 %v1510_v60  ;;  %v934_v5 = vmul.f32 0.2, %v926_v36 }
 0x4d0   :  { %v995_v52 = vmul.f32 %v1506_v56, %v994_v48  ;;  %v929_v34 = vadd.f32 %v2354_v13, %v922_v23  ;;  %v879_v3 = vmul.f32 %v1512_v41, %v2348_v59  ;;  %v1052_v63 = vmul.f32 0.2, %v1044_v10  ;;  %vm1008_vm9 = vmor %vm1006_vm3, %vm1007_vm0 }
 0x4d1   :  { %v1025_v19 = vmul.f32 %v1508_v29, %v1024_v0  ;;  %v1002_v40 = vmul.f32 %v1510_v60, %v1001_v30  ;;  %vm1048_vm2 = vcmp.ge.f32.partialorder %v1044_v10, 0.0  ;;  %vm885_vm8 = vweird.f32 %v1512_v41 }
 0x4d2   :  { %v999_v38 = vsel %vm998_vm13, %v1506_v56, %v995_v52  ;;  %vm933_vm15 = vcmp.ge.f32.partialorder %v929_v34, 0.0  ;;  %v937_v35 = vmul.f32 0.2, %v929_v34  ;;  %v880_v32 = vmul.f32 %v1512_v41, %v879_v3  ;;  %vm886_vm11 = vmor %vm884_vm10, %vm885_vm8 }
 0x4d3   :  { %v1029_v42 = vsel %vm1028_vm14, %v1508_v29, %v1025_v19  ;;  %v1034_v6 = vmul.f32 %v1030_v58, %v999_v38  ;;  %v1003_v2 = vmul.f32 0.5, %v1002_v40  ;;  %v1031_v29 = vsub.f32 %v2222_v4, %v2300_v8 }
 0x4d4   :  { %v1037_v1 = vmul.f32 %v1033_v57, %v1029_v42  ;;  %v941_v37 = vsel %vm933_vm15, %v929_v34, %v937_v35  ;;  %v881_v45 = vmul.f32 0.5, %v880_v32  ;;  %v1056_v27 = vsel %vm1048_vm2, %v1044_v10, %v1052_v63 }
 0x4d5   :  { %v1004_v28 = vsub.f32 1.5, %v1003_v2  ;;  %v945_v47 = vsel %vm24_vm1, %v941_v37, 0.0  ;;  %v2382_v24 = vpack.c.bf16 %v941_v37, %v940_v46  ;;  %v1038_v39 = vmul.f32 %v2338_v33, %v1034_v6 }
 0x4d6   :  { %v1419_v44 = vpack.i.bf16 %v945_v47, %v944_v31  ;;  %v1041_v54 = vmul.f32 %v2338_v33, %v1037_v1  ;;  %v882_v55 = vsub.f32 1.5, %v881_v45  ;;  %vm930_vm13 = vcmp.ge.f32.partialorder %v926_v36, 0.0 }
 0x4d7   :  { %v1005_v56 = vmul.f32 %v1510_v60, %v1004_v28  ;;  %v1042_v4 = vadd.f32 %v2354_v13, %v1038_v39  ;;  %v1060_v7 = vsel %vm24_vm1, %v1056_v27, 0.0  ;;  %v938_v15 = vsel %vm930_vm13, %v926_v36, %v934_v5 }
 0x4d8   :  { %1420 = vrot.lane.b32.xlu2 %v1419_v44, %s1539_s7  ;;  %v1045_v50 = vadd.f32 %v2354_v13, %v1041_v54  ;;  %v883_v17 = vmul.f32 %v1512_v41, %v882_v55  ;;  %v942_v23 = vsel %vm24_vm1, %v938_v15, 0.0 }
 0x4d9   :  { %v1009_v25 = vsel %vm1008_vm9, %v1510_v60, %v1005_v56  ;;  %v1050_v58 = vmul.f32 0.2, %v1042_v4  ;;  %vm1046_vm14 = vcmp.ge.f32.partialorder %v1042_v4, 0.0 }
 0x4da   :  { %v1035_v43 = vmul.f32 %v1031_v29, %v1009_v25  ;;  %vm1049_vm12 = vcmp.ge.f32.partialorder %v1045_v50, 0.0  ;;  %v1053_v49 = vmul.f32 0.2, %v1045_v50  ;;  %v887_v8 = vsel %vm886_vm11, %v1512_v41, %v883_v17 }
 0x4db   :  { %v913_v26 = vmul.f32 %v909_v11, %v887_v8  ;;  %v1054_v16 = vsel %vm1046_vm14, %v1042_v4, %v1050_v58 }
 0x4dc   :  { %v1057_v22 = vsel %vm1049_vm12, %v1045_v50, %v1053_v49  ;;  %v1039_v61 = vmul.f32 %v2338_v33, %v1035_v43  ;;  %v1058_v52 = vsel %vm24_vm1, %v1054_v16, 0.0 }
 0x4dd   :  { %v1061_v59 = vsel %vm24_vm1, %v1057_v22, 0.0  ;;  %v2401_v12 = vpack.c.bf16 %v1057_v22, %v1056_v27  ;;  %v920_v51 = vmul.f32 %v2338_v33, %v913_v26 }
 0x4de   :  { %v1429_v18 = vpack.i.bf16 %v1061_v59, %v1060_v7  ;;  %v1043_v53 = vadd.f32 %v2354_v13, %v1039_v61 }
 0x4df   :  { %v927_v21 = vadd.f32 %v2354_v13, %v920_v51 }
 0x4e0   :  { %1430 = vrot.lane.b32.xlu0 %v1429_v18, %s1539_s7  ;;  %1440 = vrot.lane.b32.xlu2 %v1419_v44, %s1540_s8  ;;  %vm1047_vm15 = vcmp.ge.f32.partialorder %v1043_v53, 0.0  ;;  %v1051_v14 = vmul.f32 0.2, %v1043_v53 }
 0x4e1   :  { %vm931_vm0 = vcmp.ge.f32.partialorder %v927_v21, 0.0  ;;  %v935_v48 = vmul.f32 0.2, %v927_v21 }
 0x4e2   :  { %v1055_v62 = vsel %vm1047_vm15, %v1043_v53, %v1051_v14  ;;  %v1320_v14 = vld [vmem:[%s2495_s4 + $0x20] sm:$0xff] }
 0x4e3   :  { %v1059_v33 = vsel %vm24_vm1, %v1055_v62, 0.0  ;;  %v2411_v60 = vpack.c.bf16 %v1055_v62, %v1054_v16  ;;  %v939_v0 = vsel %vm931_vm0, %v927_v21, %v935_v48  ;;  %v1321_v21 = vld [vmem:[%s2495_s4 + $0x28] sm:$0xff]  ;;  %s1541_s4 = smov [#allocation2]  }
 0x4e4   :  { %v943_v13 = vsel %vm24_vm1, %v939_v0, 0.0  ;;  %v1300_v57 = vpack.c.bf16 %v939_v0, %v938_v15  ;;  %v1454_v41 = vpack.i.bf16 %v1059_v33, %v1058_v52  ;;  %s1194_s27 = sshll.u32 %s1541_s4, 4  ;;  %s1195_s27 = int_to_ptr.vmem [resolvable:$true] %s1194_s27 }
 0x4e5   :  { %v1424_v30 = vpack.i.bf16 %v943_v13, %v942_v23 }
 0x4e7   :  { %1425 = vrot.lane.b32.xlu1 %v1424_v30, %s1539_s7 }
 0x4e8   :  { %1455 = vrot.lane.b32.xlu2 %v1454_v41, %s1540_s8  ;;  %1435 = vrot.lane.b32.xlu0 %v1454_v41, %s1539_s7 }
 0x4ef   :  { %1445 = vrot.lane.b32.xlu1 %v1429_v18, %s1540_s8 }
 0x4f0   :  { %1450 = vrot.lane.b32.xlu0 %v1424_v30, %s1540_s8 }
 0x532   :  { %v1421_v19 = vpop.permute.xlu2 %1420 }
 0x533   :  { %v1423_v10 = vunpack.i.h.bf16 %v1421_v19  ;;  %v1422_v38 = vunpack.i.l.bf16 %v1421_v19 }
 0x53a   :  { %v1441_v45 = vpop.permute.xlu2 %1440 }
 0x53b   :  { %v1443_v17 = vunpack.i.h.bf16 %v1441_v45  ;;  %v1442_v27 = vunpack.i.l.bf16 %v1441_v45 }
 0x542   :  { %v1456_v43 = vpop.permute.xlu2 %1455 }
 0x543   :  { %v1458_v5 = vunpack.i.h.bf16 %v1456_v43  ;;  %v1457_v61 = vunpack.i.l.bf16 %v1456_v43 }
 0x552   :  { %v1431_v34 = vpop.permute.xlu0 %1430 }
 0x553   :  { %v1433_v40 = vunpack.i.h.bf16 %v1431_v34  ;;  %v1432_v3 = vunpack.i.l.bf16 %v1431_v34 }
 0x555   :  { %v1105_v46 = vsel %vm379_vm4, %v1423_v10, %v1433_v40  ;;  %v1109_v42 = vsel %vm379_vm4, %v1433_v40, %v1423_v10  ;;  %v1104_v6 = vsel %vm379_vm4, %v1422_v38, %v1432_v3  ;;  %v1108_v35 = vsel %vm379_vm4, %v1432_v3, %v1422_v38 }
 0x556   :  { %v1120_v1 = vpack.c.bf16 %v1105_v46, %v1104_v6  ;;  %v1121_v2 = vpack.c.bf16 %v1109_v42, %v1108_v35 }
 0x558   :  { %1145 = vmatpush.bf16.msra.mxu0 %v1120_v1  ;;  %1322 = vmatpush.bf16.msrb.mxu2 %v1120_v1 }
 0x559   :  { %1164 = vmatpush.bf16.msra.mxu1 %v1121_v2  ;;  %1328 = vmatpush.bf16.msrb.mxu3 %v1121_v2  ;;  %v1426_v32 = vpop.permute.xlu1 %1425 }
 0x55a   :  { %v1436_v36 = vpop.permute.xlu0 %1435  ;;  %v1428_v37 = vunpack.i.h.bf16 %v1426_v32  ;;  %v1427_v31 = vunpack.i.l.bf16 %v1426_v32 }
 0x55b   :  { %v1438_v63 = vunpack.i.h.bf16 %v1436_v36  ;;  %v1437_v28 = vunpack.i.l.bf16 %v1436_v36 }
 0x55d   :  { %v1102_v47 = vsel %vm379_vm4, %v1427_v31, %v1437_v28  ;;  %v1103_v44 = vsel %vm379_vm4, %v1428_v37, %v1438_v63  ;;  %v1106_v54 = vsel %vm379_vm4, %v1437_v28, %v1427_v31  ;;  %v1107_v39 = vsel %vm379_vm4, %v1438_v63, %v1428_v37 }
 0x55e   :  { %v1118_v56 = vpack.c.bf16 %v1103_v44, %v1102_v47  ;;  %v1119_v55 = vpack.c.bf16 %v1107_v39, %v1106_v54 }
 0x560   :  { %1146 = vmatpush.bf16.msra.mxu0 %v1118_v56  ;;  %1323 = vmatpush.bf16.msrb.mxu2 %v1118_v56 }
 0x561   :  { %v1446_v29 = vpop.permute.xlu1 %1445  ;;  %1165 = vmatpush.bf16.msra.mxu1 %v1119_v55  ;;  %1329 = vmatpush.bf16.msrb.mxu3 %v1119_v55 }
 0x562   :  { %v1448_v11 = vunpack.i.h.bf16 %v1446_v29  ;;  %v1447_v50 = vunpack.i.l.bf16 %v1446_v29  ;;  %v1451_v25 = vpop.permute.xlu0 %1450 }
 0x563   :  { %v1453_v49 = vunpack.i.h.bf16 %v1451_v25  ;;  %v1452_v4 = vunpack.i.l.bf16 %v1451_v25 }
 0x564   :  { %1298 = vmatpush.bf16.msk.msra.mxu0 %vm1879_vm5, %v2382_v24  ;;  %1324 = vmatpush.bf16.msk.msrb.mxu2 %vm1879_vm5, %v2382_v24  ;;  %v1084_v8 = vsel %vm354_vm6, %v1447_v50, %v1442_v27  ;;  %v1085_v26 = vsel %vm354_vm6, %v1448_v11, %v1443_v17  ;;  %v1080_v24 = vsel %vm354_vm6, %v1442_v27, %v1447_v50 }
 0x565   :  { %1306 = vmatpush.bf16.msk.msra.mxu1 %vm1879_vm5, %v2401_v12  ;;  %1330 = vmatpush.bf16.msk.msrb.mxu3 %vm1879_vm5, %v2401_v12  ;;  %v1081_v22 = vsel %vm354_vm6, %v1443_v17, %v1448_v11  ;;  %v1112_v7 = vpack.c.bf16 %v1085_v26, %v1084_v8  ;;  %v1082_v12 = vsel %vm354_vm6, %v1457_v61, %v1452_v4 }
 0x566   :  { %v1113_v59 = vpack.c.bf16 %v1081_v22, %v1080_v24  ;;  %v1083_v18 = vsel %vm354_vm6, %v1458_v5, %v1453_v49  ;;  %v1078_v51 = vsel %vm354_vm6, %v1452_v4, %v1457_v61  ;;  %v1079_v53 = vsel %vm354_vm6, %v1453_v49, %v1458_v5 }
 0x567   :  { %v1110_v20 = vpack.c.bf16 %v1083_v18, %v1082_v12  ;;  %v1111_v58 = vpack.c.bf16 %v1079_v53, %v1078_v51 }
 0x568   :  { %1301 = vmatpush.bf16.msk.msra.mxu0 %vm1879_vm5, %v1300_v57  ;;  %1325 = vmatpush.bf16.msk.msrb.mxu2 %vm1879_vm5, %v1300_v57 }
 0x569   :  { %1309 = vmatpush.bf16.msk.msra.mxu1 %vm1879_vm5, %v2411_v60  ;;  %1331 = vmatpush.bf16.msk.msrb.mxu3 %vm1879_vm5, %v2411_v60 }
 0x56c   :  { %1149 = vmatpush.bf16.msra.mxu0 %v1112_v7  ;;  %1326 = vmatpush.bf16.msrb.mxu2 %v1112_v7 }
 0x56d   :  { %1168 = vmatpush.bf16.msra.mxu1 %v1113_v59  ;;  %1332 = vmatpush.bf16.msrb.mxu3 %v1113_v59 }
 0x570   :  { %1150 = vmatpush.bf16.msra.mxu0 %v1110_v20  ;;  %1327 = vmatpush.bf16.msrb.mxu2 %v1110_v20 }
 0x571   :  { %1169 = vmatpush.bf16.msra.mxu1 %v1111_v58  ;;  %1333 = vmatpush.bf16.msrb.mxu3 %v1111_v58 }
 0x573   :  { %1303 = vmatmul.msk.bf16.vlgmr.msrb.gmra.mxu2 %vm414_vm7, %v1321_v21  ;;  %1302 = vmatmul.msk.bf16.vlgmr.msra.gmra.mxu0 %vm414_vm7, %v1320_v14 }
 0x574   :  { %1311 = vmatmul.msk.bf16.vlgmr.msrb.gmra.mxu3 %vm414_vm7, %v1321_v21  ;;  %1310 = vmatmul.msk.bf16.vlgmr.msra.gmra.mxu1 %vm414_vm7, %v1320_v14 }
 0x5f0   :  { %v1152_v9 = vpop.f32.mrf.mxu0 }
 0x5f1   :  { %1181 = vst [vmem:[#allocation2] sm:$0xff] %v1152_v9  ;;  %v1171_v15 = vpop.f32.mrf.mxu1 }
 0x5f2   :  { %1186 = vst [vmem:[#allocation2 + $0x20] sm:$0xff] %v1171_v15 }
 0x5f6   :  { %v1157_v48 = vpop.f32.mrf.mxu2 }
 0x5f7   :  { %1183 = vst [vmem:[#allocation2 + $0x10] sm:$0xff] %v1157_v48  ;;  %v1176_v16 = vpop.f32.mrf.mxu3 }
 0x5f8   :  { %1188 = vst [vmem:[#allocation2 + $0x30] sm:$0xff] %v1176_v16  ;;  %v1154_v62 = vpop.f32.mrf.mxu0 }
 0x5f9   :  { %1182 = vst [vmem:[#allocation2 + $0x8] sm:$0xff] %v1154_v62  ;;  %v1173_v33 = vpop.f32.mrf.mxu1 }
 0x5fa   :  { %1187 = vst [vmem:[#allocation2 + $0x28] sm:$0xff] %v1173_v33 }
 0x5fe   :  { %v1159_v60 = vpop.f32.mrf.mxu2 }
 0x5ff   :  { %1184 = vst [vmem:[#allocation2 + $0x18] sm:$0xff] %v1159_v60  ;;  %v1178_v0 = vpop.f32.mrf.mxu3 }
 0x600   :  { %1189 = vst [vmem:[#allocation2 + $0x38] sm:$0xff] %v1178_v0 }
 0x601   :  { %1202 = dma.vmem_to_hbm [thread:$0]  %s1195_s27, 1024, %s1197_s0, [#allocation3], %s1542_s1, %s1542_s1, %s1543_s30  }
 0x602   :  { %1537 = dma.done.wait [#allocation3], 1024  }
 0x603   :  { %1538 = vsyncadd [#allocation3], 4294966272 }
 0x604   :  { %1207 = vsyncpa [#allocation3], 1 }

</bundles_post_ra>
